<compile_context>
chip_gen: v5e
topology: v5e:2x2
jax: 0.10.0
libtpu: 0.0.40
codegen_flags: <defaults>
</compile_context>

<pallas_src>
import functools

import jax
import jax.numpy as jnp
from jax.experimental import pallas as pl
from jax.experimental.pallas import tpu as pltpu

BN_EPS = 1e-5
# bf16 matmul operands with f32 MXU accumulation on ALL generations (v5e's
# MXU is native bf16; f32 matmul would be emulated and ~4x slower there).
MATMUL_DTYPE = jnp.bfloat16
TM_MAX = 1024   # max rows of the flattened M = N*Ho*Wo axis per grid step
CHUNK = 128     # rows per in-kernel matmul chunk (keeps f32 y small)


def _round_up(x, m):
    return (x + m - 1) // m * m


def _pick_tile(m, tmax=TM_MAX):
    # Non-overshooting tile: split M into the fewest tiles <= tmax; force at
    # least 2 grid steps when there is enough work so dimension_semantics
    # "parallel" can shard across v7x's two TensorCores.
    min_steps = 2 if m > 512 else 1
    nt = max(min_steps, -(-m // tmax))
    return _round_up(-(-m // nt), 8)


def _vmem_limit(tile_bytes):
    # double-buffered tiles + headroom; fits every generation (v7x: 64 MiB/TC)
    return int(min(2 * tile_bytes + (16 << 20), 48 << 20))


# ----------------------------------------------------------------------------
# Pallas kernels
# ----------------------------------------------------------------------------
def _conv_stats_kernel(*refs, chunks, fuse):
    # refs (fused):    p, w, scale_tap, shift_tap | y, stats | pact scratch
    # refs (unfused):  p, w                       | y, stats
    if fuse:
        p_ref, w_ref, scale_ref, shift_ref, y_ref, stats_ref, pact_ref = refs
    else:
        p_ref, w_ref, y_ref, stats_ref = refs
        scale_ref = shift_ref = pact_ref = None

    cout = y_ref.shape[1]
    s = jnp.zeros((1, cout), jnp.float32)
    sq = jnp.zeros((1, cout), jnp.float32)

    # Static chunk loop: each matmul keeps full contraction depth K*Cin but a
    # small f32 result (<=128 x Cout), so the sum / sum-of-squares reduction
    # never spills vregs even at TM = 1024.
    r0 = 0
    for ci, cs in enumerate(chunks):
        p = p_ref[r0:r0 + cs, :]
        if fuse:
            # Previous BN affine + ReLU fused onto the patch tile (VPU work
            # hidden under the MXU).  Two scratch slots let chunk c's affine
            # overlap chunk c-1's matmul.
            slot = ci % 2
            a = jnp.maximum(
                p.astype(jnp.float32) * scale_ref[...] + shift_ref[...], 0.0)
            pact_ref[slot, :cs, :] = a.astype(MATMUL_DTYPE)
            p = pact_ref[slot, :cs, :]
        y = jnp.dot(p, w_ref[...], preferred_element_type=jnp.float32)
        y_ref[r0:r0 + cs, :] = y.astype(y_ref.dtype)
        s = s + jnp.sum(y, axis=0, keepdims=True)
        sq = sq + jnp.sum(y * y, axis=0, keepdims=True)
        r0 += cs

    # Stats block padded to 8 sublanes (rows 0/1 used); no concatenate.
    stats_ref[...] = jnp.zeros_like(stats_ref)
    stats_ref[:, 0:1, :] = s[None]
    stats_ref[:, 1:2, :] = sq[None]


def _bn_apply_kernel(y_ref, scale_ref, shift_ref, out_ref, *, relu):
    v = y_ref[...].astype(jnp.float32) * scale_ref[...] + shift_ref[...]
    if relu:
        v = jnp.maximum(v, 0.0)
    out_ref[...] = v.astype(out_ref.dtype)


def _bn_apply_res_kernel(y_ref, scale_ref, shift_ref, res_ref, out_ref, *,
                         relu):
    v = (y_ref[...].astype(jnp.float32) * scale_ref[...] + shift_ref[...]
         + res_ref[...].astype(jnp.float32))
    if relu:
        v = jnp.maximum(v, 0.0)
    out_ref[...] = v.astype(out_ref.dtype)


# ----------------------------------------------------------------------------
# pallas_call wrappers
# ----------------------------------------------------------------------------
def _conv_stats_call(patches, w, tm, scale_tap=None, shift_tap=None):
    m_pad, kc = patches.shape
    cout = w.shape[1]
    nt = m_pad // tm
    fuse = scale_tap is not None
    chunk = min(tm, CHUNK)
    chunks = tuple([chunk] * (tm // chunk)
                   + ([tm % chunk] if tm % chunk else []))

    tile_bytes = (tm * kc * 2 + kc * cout * 2 + tm * cout * 2 + 8 * cout * 4)
    in_specs = [pl.BlockSpec((tm, kc), lambda i: (i, 0)),
                pl.BlockSpec((kc, cout), lambda i: (0, 0))]
    args = [patches, w]
    scratch = []
    if fuse:
        in_specs += [pl.BlockSpec((1, kc), lambda i: (0, 0)),
                     pl.BlockSpec((1, kc), lambda i: (0, 0))]
        args += [scale_tap, shift_tap]
        scratch = [pltpu.VMEM((2, chunk, kc), MATMUL_DTYPE)]
        tile_bytes += 2 * kc * 4 + 2 * chunk * kc * 2

    return pl.pallas_call(
        functools.partial(_conv_stats_kernel, chunks=chunks, fuse=fuse),
        out_shape=(jax.ShapeDtypeStruct((m_pad, cout), MATMUL_DTYPE),
                   jax.ShapeDtypeStruct((nt, 8, cout), jnp.float32)),
        grid=(nt,),
        in_specs=in_specs,
        out_specs=(pl.BlockSpec((tm, cout), lambda i: (i, 0)),
                   pl.BlockSpec((1, 8, cout), lambda i: (i, 0, 0))),
        scratch_shapes=scratch,
        compiler_params=pltpu.CompilerParams(
            dimension_semantics=("parallel",),
            vmem_limit_bytes=_vmem_limit(tile_bytes)),
    )(*args)


def _bn_apply_call(y, scale, shift, tm, relu, res=None):
    m_pad, cout = y.shape
    nt = m_pad // tm
    nstream = 2 if res is None else 3
    tile_bytes = nstream * tm * cout * 2 + 2 * cout * 4
    common = dict(
        out_shape=jax.ShapeDtypeStruct((m_pad, cout), MATMUL_DTYPE),
        grid=(nt,),
        out_specs=pl.BlockSpec((tm, cout), lambda i: (i, 0)),
        compiler_params=pltpu.CompilerParams(
            dimension_semantics=("parallel",),
            vmem_limit_bytes=_vmem_limit(tile_bytes)),
    )
    if res is None:
        return pl.pallas_call(
            functools.partial(_bn_apply_kernel, relu=relu),
            in_specs=[pl.BlockSpec((tm, cout), lambda i: (i, 0)),
                      pl.BlockSpec((1, cout), lambda i: (0, 0)),
                      pl.BlockSpec((1, cout), lambda i: (0, 0))],
            **common,
        )(y, scale, shift)
    return pl.pallas_call(
        functools.partial(_bn_apply_res_kernel, relu=relu),
        in_specs=[pl.BlockSpec((tm, cout), lambda i: (i, 0)),
                  pl.BlockSpec((1, cout), lambda i: (0, 0)),
                  pl.BlockSpec((1, cout), lambda i: (0, 0)),
                  pl.BlockSpec((tm, cout), lambda i: (i, 0))],
        **common,
    )(y, scale, shift, res)


# ----------------------------------------------------------------------------
# Glue: bf16 patch extraction (plain JAX) and layer wiring
# ----------------------------------------------------------------------------
def _extract_patches(x, ksize, stride, pad, m_pad, pad_vec=None):
    """bf16 NHWC -> lane-contiguous (m_pad, K*C) bf16 patch slab, tap-major.

    The slab is built directly from the bf16 activation (one bf16 write).
    `pad_vec` (per-channel) replaces zero padding when the consumer fuses an
    affine+ReLU; it is chosen so the fused ReLU maps halo / M-padding entries
    to exactly 0.
    TODO(synk): replace with an in-kernel haloed-row DMA gather / implicit
    GEMM so the Kx activation slab never hits HBM.
    """
    n, h, w, c = x.shape
    ho = (h + 2 * pad - ksize) // stride + 1
    wo = (w + 2 * pad - ksize) // stride + 1
    m = n * ho * wo
    kc = ksize * ksize * c
    if ksize == 1 and pad == 0:
        p = x[:, ::stride, ::stride, :].reshape(m, c)
    else:
        if pad_vec is None:
            xp = jnp.pad(x, ((0, 0), (pad, pad), (pad, pad), (0, 0)))
        else:
            xp = jnp.broadcast_to(pad_vec.astype(x.dtype),
                                  (n, h + 2 * pad, w + 2 * pad, c))
            xp = xp.at[:, pad:pad + h, pad:pad + w, :].set(x)
        taps = [xp[:, kh:kh + stride * ho:stride, kw:kw + stride * wo:stride, :]
                for kh in range(ksize) for kw in range(ksize)]
        p = jnp.stack(taps, axis=3).reshape(m, kc)
    if m_pad > m:
        if pad_vec is None:
            fill = jnp.zeros((m_pad - m, kc), p.dtype)
        else:
            fill = jnp.broadcast_to(
                jnp.tile(pad_vec.astype(p.dtype), ksize * ksize),
                (m_pad - m, kc))
        p = jnp.concatenate([p, fill], axis=0)
    return p


def _conv_bn_stats(x_nhwc, p, stride, pad, in_scale=None, in_shift=None):
    """Pass A: raw conv (bias dropped; exact under training-mode BN) + batch
    stats; optionally with the previous BN affine + ReLU fused onto the patch
    tile.  Returns (raw conv bf16 (m_pad, cout), bn_scale, bn_shift, dims, m,
    tm)."""
    w = p["w"]
    kh, kw, cin, cout = w.shape
    n, h, wd, _ = x_nhwc.shape
    ho = (h + 2 * pad - kh) // stride + 1
    wo = (wd + 2 * pad - kw) // stride + 1
    m = n * ho * wo
    kc = kh * kw * cin
    tm = _pick_tile(m)
    m_pad = _round_up(m, tm)

    pad_vec = scale_tap = shift_tap = None
    if in_scale is not None:
        # Neutral padding value v with in_scale*v + in_shift strictly negative
        # (robust to bf16 rounding of v), so the fused ReLU maps halo /
        # M-padding rows to exactly 0 -- identical to zero-padding the
        # *activated* input, keeping the conv and the next BN stats exact.
        # (Only degenerate if a gamma is exactly 0, which the init avoids.)
        safe = jnp.where(in_scale == 0.0, 1.0, in_scale)
        t = -in_shift / safe
        pad_vec = jnp.where(in_scale == 0.0, 0.0,
                            t - jnp.sign(safe) * (0.125 * jnp.abs(t) + 1.0))
        scale_tap = jnp.tile(in_scale, kh * kw).reshape(1, kc)
        shift_tap = jnp.tile(in_shift, kh * kw).reshape(1, kc)
        scale_tap = scale_tap.astype(jnp.float32)
        shift_tap = shift_tap.astype(jnp.float32)

    patches = _extract_patches(x_nhwc, kh, stride, pad, m_pad, pad_vec)
    w2 = w.reshape(kc, cout).astype(MATMUL_DTYPE)

    y, part = _conv_stats_call(patches, w2, tm, scale_tap, shift_tap)

    # Finalize biased (training-mode) batch statistics over the true M rows;
    # zero-contribution padding rows keep them exact.
    # TODO(synk): switch to per-tile centered/Welford partials if tighter
    # agreement with torch's two-pass variance is ever required.
    s = jnp.sum(part[:, 0, :], axis=0)
    sq = jnp.sum(part[:, 1, :], axis=0)
    mean = s / m
    var = jnp.maximum(sq / m - mean * mean, 0.0)
    scale = p["gamma"] * jax.lax.rsqrt(var + BN_EPS)
    shift = p["beta"] - mean * scale
    return y, scale, shift, (n, ho, wo), m, tm


def _downconv(x_nhwc, p):
    y, scale, shift, (n, ho, wo), m, tm = _conv_bn_stats(x_nhwc, p, 2, 0)
    cout = p["w"].shape[-1]
    out = _bn_apply_call(y, scale.reshape(1, cout).astype(jnp.float32),
                         shift.reshape(1, cout).astype(jnp.float32),
                         tm, relu=False)
    return out[:m].reshape(n, ho, wo, cout)


def resnet34_block(x_nhwc, p, stride, residual_nhwc):
    """relu(bn2(conv2(relu(bn1(conv1(x))))) + residual), all tiled."""
    n = x_nhwc.shape[0]
    # conv1 pass A only -- its BN-apply + ReLU is fused into conv2's pass A.
    y1, s1, sh1, (_, ho1, wo1), m1, _ = _conv_bn_stats(
        x_nhwc, p["conv1"], stride, 1)
    c1 = p["conv1"]["w"].shape[-1]
    y1_nhwc = y1[:m1].reshape(n, ho1, wo1, c1)

    # conv2 pass A with fused bn1-affine + ReLU on the patch tile.
    y2, s2, sh2, (_, ho2, wo2), m2, tm2 = _conv_bn_stats(
        y1_nhwc, p["conv2"], 1, 1, in_scale=s1, in_shift=sh1)
    c2 = p["conv2"]["w"].shape[-1]

    # pass B: bn2 affine + residual add + ReLU, bf16 streams.
    m_pad2 = y2.shape[0]
    res = residual_nhwc.reshape(m2, c2).astype(MATMUL_DTYPE)
    if m_pad2 != m2:
        res = jnp.pad(res, ((0, m_pad2 - m2), (0, 0)))
    out = _bn_apply_call(y2, s2.reshape(1, c2).astype(jnp.float32),
                         sh2.reshape(1, c2).astype(jnp.float32),
                         tm2, relu=True, res=res)
    return out[:m2].reshape(n, ho2, wo2, c2)


def resnet34_3_forward(x_nchw, params):
    # NCHW -> NHWC, cast to bf16 once (all patch slabs are built in bf16).
    x = jnp.transpose(x_nchw, (0, 2, 3, 1)).astype(MATMUL_DTYPE)
    d = _downconv(x, params["down"])                    # bn(1x1 conv s2), no relu
    x1 = resnet34_block(x, params["layer1"], 2, d)      # relu(layer1(x)+down(x))
    x2 = resnet34_block(x1, params["layer2"], 1, x1)    # relu(layer2(x1)+x1)
    x3 = resnet34_block(x2, params["layer3"], 1, x2)
    x4 = resnet34_block(x3, params["layer4"], 1, x3)
    return jnp.transpose(x4, (0, 3, 1, 2)).astype(jnp.float32)  # NHWC -> NCHW


# ----------------------------------------------------------------------------
# Pure-JAX f32 reference (for a loose numerical check) and parameter init
# ----------------------------------------------------------------------------
def _reference_forward(x_nchw, params):
    x = jnp.transpose(x_nchw, (0, 2, 3, 1)).astype(jnp.float32)

    def conv(h, p, stride, pad):
        return jax.lax.conv_general_dilated(
            h, p["w"], (stride, stride), [(pad, pad), (pad, pad)],
            dimension_numbers=("NHWC", "HWIO", "NHWC")) + p["b"]

    def bn(h, p):
        mean = jnp.mean(h, axis=(0, 1, 2))
        var = jnp.mean((h - mean) ** 2, axis=(0, 1, 2))
        return (h - mean) * jax.lax.rsqrt(var + BN_EPS) * p["gamma"] + p["beta"]

    def block(h, p, stride):
        a = jax.nn.relu(bn(conv(h, p["conv1"], stride, 1), p["conv1"]))
        return bn(conv(a, p["conv2"], 1, 1), p["conv2"])

    d = bn(conv(x, params["down"], 2, 0), params["down"])
    x1 = jax.nn.relu(block(x, params["layer1"], 2) + d)
    x2 = jax.nn.relu(block(x1, params["layer2"], 1) + x1)
    x3 = jax.nn.relu(block(x2, params["layer3"], 1) + x2)
    x4 = jax.nn.relu(block(x3, params["layer4"], 1) + x3)
    return jnp.transpose(x4, (0, 3, 1, 2))


def _init_conv_bn(key, kh, kw, cin, cout):
    k1, k2, k3, k4 = jax.random.split(key, 4)
    fan_in = kh * kw * cin
    return {
        "w": jax.random.normal(k1, (kh, kw, cin, cout), jnp.float32)
        / jnp.sqrt(float(fan_in)),
        # conv bias kept for shape parity with nn.Conv2d; its effect is
        # cancelled exactly by the training-mode BN mean subtraction.
        "b": 0.01 * jax.random.normal(k2, (cout,), jnp.float32),
        "gamma": 1.0 + 0.1 * jax.random.normal(k3, (cout,), jnp.float32),
        "beta": 0.1 * jax.random.normal(k4, (cout,), jnp.float32),
    }


def init_params(key):
    ks = jax.random.split(key, 9)
    return {
        "layer1": {"conv1": _init_conv_bn(ks[0], 3, 3, 64, 128),
                   "conv2": _init_conv_bn(ks[1], 3, 3, 128, 128)},
        "down": _init_conv_bn(ks[2], 1, 1, 64, 128),
        "layer2": {"conv1": _init_conv_bn(ks[3], 3, 3, 128, 128),
                   "conv2": _init_conv_bn(ks[4], 3, 3, 128, 128)},
        "layer3": {"conv1": _init_conv_bn(ks[5], 3, 3, 128, 128),
                   "conv2": _init_conv_bn(ks[6], 3, 3, 128, 128)},
        "layer4": {"conv1": _init_conv_bn(ks[7], 3, 3, 128, 128),
                   "conv2": _init_conv_bn(ks[8], 3, 3, 128, 128)},
    }


if __name__ == "__main__":
    key = jax.random.PRNGKey(0)
    pkey, xkey = jax.random.split(key)
    params = init_params(pkey)

    # Small input consistent with the module: 64 input channels (fixed by the
    # architecture), batch=2, spatial=8 -> output (2, 128, 4, 4).
    x = jax.random.normal(xkey, (2, 64, 8, 8), jnp.float32)

    fwd = jax.jit(resnet34_3_forward)
    out = jax.block_until_ready(fwd(x, params))

    assert out.shape == (2, 128, 4, 4), out.shape
    assert bool(jnp.all(jnp.isfinite(out)))

    # Loose check vs a pure-JAX f32 reference (bf16 matmul operands / bf16
    # intermediates mean bit-exactness is not expected).
    ref = jax.block_until_ready(jax.jit(_reference_forward)(x, params))
    err = float(jnp.max(jnp.abs(out - ref) / (1.0 + jnp.abs(ref))))
    assert err < 0.1, f"mismatch vs f32 reference: {err}"

    print("KERNEL_OK")
</pallas_src>

<mosaic_0001>
module attributes {stable_mosaic.version = 11 : i64} {
  func.func @_conv_stats_kernel(%arg0: i32, %arg1: memref<32x64xbf16, #tpu.memory_space<vmem>>, %arg2: memref<64x128xbf16, #tpu.memory_space<vmem>>, %arg3: memref<32x128xbf16, #tpu.memory_space<vmem>>, %arg4: memref<1x8x128xf32, #tpu.memory_space<vmem>>) attributes {dimension_semantics = [#tpu.dimension_semantics<parallel>], iteration_bounds = array<i64: 1>, scalar_prefetch = 0 : i64, scratch_operands = 0 : i64, tpu.core_type = #tpu.core_type<tc>, window_params = [{transform_indices = @transform_0, window_bounds = array<i64: 32, 64>}, {pipeline_mode = #tpu.pipeline_mode<synchronous>, transform_indices = @transform_1, window_bounds = array<i64: 64, 128>}, {transform_indices = @transform_2, window_bounds = array<i64: 32, 128>}, {transform_indices = @transform_3, window_bounds = array<i64: 1, 8, 128>}]} {
    %cst = arith.constant 0.000000e+00 : f32
    %0 = vector.broadcast %cst : f32 to vector<1x128xf32>
    %cst_0 = arith.constant 0.000000e+00 : f32
    %1 = vector.broadcast %cst_0 : f32 to vector<1x128xf32>
    %c0 = arith.constant 0 : index
    %c0_1 = arith.constant 0 : index
    %2 = vector.load %arg1[%c0, %c0_1] : memref<32x64xbf16, #tpu.memory_space<vmem>>, vector<32x64xbf16>
    %c0_2 = arith.constant 0 : index
    %c0_3 = arith.constant 0 : index
    %3 = vector.load %arg2[%c0_2, %c0_3] : memref<64x128xbf16, #tpu.memory_space<vmem>>, vector<64x128xbf16>
    %cst_4 = arith.constant dense<0.000000e+00> : vector<32x128xf32>
    %4 = tpu.matmul %2, %3, %cst_4 {dimension_numbers = #tpu.dot_dimension_numbers<[1], [0], [0], [1], [0, 0, 1, 1], [], []>} : vector<32x64xbf16>, vector<64x128xbf16>, vector<32x128xf32> -> vector<32x128xf32>
    %5 = arith.truncf %4 : vector<32x128xf32> to vector<32x128xbf16>
    %c0_5 = arith.constant 0 : index
    %c0_6 = arith.constant 0 : index
    %6 = vector.load %arg3[%c0_5, %c0_6] : memref<32x128xbf16, #tpu.memory_space<vmem>>, vector<32x128xbf16>
    tpu.vector_store %arg3[%c0_5, %c0_6], %5 {strides = array<i32>} : memref<32x128xbf16, #tpu.memory_space<vmem>>, vector<32x128xbf16>,
    %cst_7 = arith.constant dense<0.000000e+00> : vector<128xf32>
    %7 = vector.multi_reduction <add>, %4, %cst_7 [0] : vector<32x128xf32> to vector<128xf32>
    %8 = vector.shape_cast %7 : vector<128xf32> to vector<1x128xf32>
    %9 = arith.addf %0, %8 : vector<1x128xf32>
    %10 = arith.mulf %4, %4 : vector<32x128xf32>
    %cst_8 = arith.constant dense<0.000000e+00> : vector<128xf32>
    %11 = vector.multi_reduction <add>, %10, %cst_8 [0] : vector<32x128xf32> to vector<128xf32>
    %12 = vector.shape_cast %11 : vector<128xf32> to vector<1x128xf32>
    %13 = arith.addf %1, %12 : vector<1x128xf32>
    %cst_9 = arith.constant 0.000000e+00 : f32
    %14 = vector.broadcast %cst_9 : f32 to vector<1x8x128xf32>
    %c0_10 = arith.constant 0 : index
    %c0_11 = arith.constant 0 : index
    %c0_12 = arith.constant 0 : index
    %15 = vector.load %arg4[%c0_10, %c0_11, %c0_12] : memref<1x8x128xf32, #tpu.memory_space<vmem>>, vector<1x8x128xf32>
    tpu.vector_store %arg4[%c0_10, %c0_11, %c0_12], %14 {strides = array<i32>} : memref<1x8x128xf32, #tpu.memory_space<vmem>>, vector<1x8x128xf32>,
    %16 = vector.shape_cast %9 : vector<1x128xf32> to vector<1x1x128xf32>
    %c0_13 = arith.constant 0 : index
    %c0_14 = arith.constant 0 : index
    %c0_15 = arith.constant 0 : index
    %17 = vector.load %arg4[%c0_13, %c0_14, %c0_15] : memref<1x8x128xf32, #tpu.memory_space<vmem>>, vector<1x1x128xf32>
    tpu.vector_store %arg4[%c0_13, %c0_14, %c0_15], %16 {strides = array<i32>} : memref<1x8x128xf32, #tpu.memory_space<vmem>>, vector<1x1x128xf32>,
    %18 = vector.shape_cast %13 : vector<1x128xf32> to vector<1x1x128xf32>
    %c0_16 = arith.constant 0 : index
    %c1 = arith.constant 1 : index
    %c0_17 = arith.constant 0 : index
    %19 = vector.load %arg4[%c0_16, %c1, %c0_17] : memref<1x8x128xf32, #tpu.memory_space<vmem>>, vector<1x1x128xf32>
    tpu.vector_store %arg4[%c0_16, %c1, %c0_17], %18 {strides = array<i32>} : memref<1x8x128xf32, #tpu.memory_space<vmem>>, vector<1x1x128xf32>,
    return
  }
  func.func @transform_0(%arg0: i32) -> (i32, i32) {
    %c0_i32 = arith.constant 0 : i32
    %c0_i32_0 = arith.constant 0 : i32
    return %arg0, %c0_i32 : i32, i32
  }
  func.func @transform_1(%arg0: i32) -> (i32, i32) {
    %c0_i32 = arith.constant 0 : i32
    %c0_i32_0 = arith.constant 0 : i32
    %c0_i32_1 = arith.constant 0 : i32
    return %c0_i32, %c0_i32_0 : i32, i32
  }
  func.func @transform_2(%arg0: i32) -> (i32, i32) {
    %c0_i32 = arith.constant 0 : i32
    %c0_i32_0 = arith.constant 0 : i32
    return %arg0, %c0_i32 : i32, i32
  }
  func.func @transform_3(%arg0: i32) -> (i32, i32, i32) {
    %c0_i32 = arith.constant 0 : i32
    %c0_i32_0 = arith.constant 0 : i32
    %c0_i32_1 = arith.constant 0 : i32
    return %arg0, %c0_i32, %c0_i32_0 : i32, i32, i32
  }
}

module attributes {stable_mosaic.version = 11 : i64} {
  func.func @_bn_apply_kernel(%arg0: i32, %arg1: memref<32x128xbf16, #tpu.memory_space<vmem>>, %arg2: memref<1x128xf32, #tpu.memory_space<vmem>>, %arg3: memref<1x128xf32, #tpu.memory_space<vmem>>, %arg4: memref<32x128xbf16, #tpu.memory_space<vmem>>) attributes {dimension_semantics = [#tpu.dimension_semantics<parallel>], iteration_bounds = array<i64: 1>, scalar_prefetch = 0 : i64, scratch_operands = 0 : i64, tpu.core_type = #tpu.core_type<tc>, window_params = [{transform_indices = @transform_0, window_bounds = array<i64: 32, 128>}, {pipeline_mode = #tpu.pipeline_mode<synchronous>, transform_indices = @transform_1, window_bounds = array<i64: 1, 128>}, {pipeline_mode = #tpu.pipeline_mode<synchronous>, transform_indices = @transform_2, window_bounds = array<i64: 1, 128>}, {transform_indices = @transform_3, window_bounds = array<i64: 32, 128>}]} {
    %c0 = arith.constant 0 : index
    %c0_0 = arith.constant 0 : index
    %0 = vector.load %arg1[%c0, %c0_0] : memref<32x128xbf16, #tpu.memory_space<vmem>>, vector<32x128xbf16>
    %1 = arith.extf %0 : vector<32x128xbf16> to vector<32x128xf32>
    %c0_1 = arith.constant 0 : index
    %c0_2 = arith.constant 0 : index
    %2 = vector.load %arg2[%c0_1, %c0_2] : memref<1x128xf32, #tpu.memory_space<vmem>>, vector<1x128xf32>
    %3 = vector.broadcast %2 : vector<1x128xf32> to vector<32x128xf32>
    %4 = arith.mulf %1, %3 : vector<32x128xf32>
    %c0_3 = arith.constant 0 : index
    %c0_4 = arith.constant 0 : index
    %5 = vector.load %arg3[%c0_3, %c0_4] : memref<1x128xf32, #tpu.memory_space<vmem>>, vector<1x128xf32>
    %6 = vector.broadcast %5 : vector<1x128xf32> to vector<32x128xf32>
    %7 = arith.addf %4, %6 : vector<32x128xf32>
    %8 = arith.truncf %7 : vector<32x128xf32> to vector<32x128xbf16>
    %c0_5 = arith.constant 0 : index
    %c0_6 = arith.constant 0 : index
    %9 = vector.load %arg4[%c0_5, %c0_6] : memref<32x128xbf16, #tpu.memory_space<vmem>>, vector<32x128xbf16>
    tpu.vector_store %arg4[%c0_5, %c0_6], %8 {strides = array<i32>} : memref<32x128xbf16, #tpu.memory_space<vmem>>, vector<32x128xbf16>,
    return
  }
  func.func @transform_0(%arg0: i32) -> (i32, i32) {
    %c0_i32 = arith.constant 0 : i32
    %c0_i32_0 = arith.constant 0 : i32
    return %arg0, %c0_i32 : i32, i32
  }
  func.func @transform_1(%arg0: i32) -> (i32, i32) {
    %c0_i32 = arith.constant 0 : i32
    %c0_i32_0 = arith.constant 0 : i32
    %c0_i32_1 = arith.constant 0 : i32
    return %c0_i32, %c0_i32_0 : i32, i32
  }
  func.func @transform_2(%arg0: i32) -> (i32, i32) {
    %c0_i32 = arith.constant 0 : i32
    %c0_i32_0 = arith.constant 0 : i32
    %c0_i32_1 = arith.constant 0 : i32
    return %c0_i32, %c0_i32_0 : i32, i32
  }
  func.func @transform_3(%arg0: i32) -> (i32, i32) {
    %c0_i32 = arith.constant 0 : i32
    %c0_i32_0 = arith.constant 0 : i32
    return %arg0, %c0_i32 : i32, i32
  }
}

module attributes {stable_mosaic.version = 11 : i64} {
  func.func @_conv_stats_kernel(%arg0: i32, %arg1: memref<32x576xbf16, #tpu.memory_space<vmem>>, %arg2: memref<576x128xbf16, #tpu.memory_space<vmem>>, %arg3: memref<32x128xbf16, #tpu.memory_space<vmem>>, %arg4: memref<1x8x128xf32, #tpu.memory_space<vmem>>) attributes {dimension_semantics = [#tpu.dimension_semantics<parallel>], iteration_bounds = array<i64: 1>, scalar_prefetch = 0 : i64, scratch_operands = 0 : i64, tpu.core_type = #tpu.core_type<tc>, window_params = [{transform_indices = @transform_0, window_bounds = array<i64: 32, 576>}, {pipeline_mode = #tpu.pipeline_mode<synchronous>, transform_indices = @transform_1, window_bounds = array<i64: 576, 128>}, {transform_indices = @transform_2, window_bounds = array<i64: 32, 128>}, {transform_indices = @transform_3, window_bounds = array<i64: 1, 8, 128>}]} {
    %cst = arith.constant 0.000000e+00 : f32
    %0 = vector.broadcast %cst : f32 to vector<1x128xf32>
    %cst_0 = arith.constant 0.000000e+00 : f32
    %1 = vector.broadcast %cst_0 : f32 to vector<1x128xf32>
    %c0 = arith.constant 0 : index
    %c0_1 = arith.constant 0 : index
    %2 = vector.load %arg1[%c0, %c0_1] : memref<32x576xbf16, #tpu.memory_space<vmem>>, vector<32x576xbf16>
    %c0_2 = arith.constant 0 : index
    %c0_3 = arith.constant 0 : index
    %3 = vector.load %arg2[%c0_2, %c0_3] : memref<576x128xbf16, #tpu.memory_space<vmem>>, vector<576x128xbf16>
    %cst_4 = arith.constant dense<0.000000e+00> : vector<32x128xf32>
    %4 = tpu.matmul %2, %3, %cst_4 {dimension_numbers = #tpu.dot_dimension_numbers<[1], [0], [0], [1], [0, 0, 1, 1], [], []>} : vector<32x576xbf16>, vector<576x128xbf16>, vector<32x128xf32> -> vector<32x128xf32>
    %5 = arith.truncf %4 : vector<32x128xf32> to vector<32x128xbf16>
    %c0_5 = arith.constant 0 : index
    %c0_6 = arith.constant 0 : index
    %6 = vector.load %arg3[%c0_5, %c0_6] : memref<32x128xbf16, #tpu.memory_space<vmem>>, vector<32x128xbf16>
    tpu.vector_store %arg3[%c0_5, %c0_6], %5 {strides = array<i32>} : memref<32x128xbf16, #tpu.memory_space<vmem>>, vector<32x128xbf16>,
    %cst_7 = arith.constant dense<0.000000e+00> : vector<128xf32>
    %7 = vector.multi_reduction <add>, %4, %cst_7 [0] : vector<32x128xf32> to vector<128xf32>
    %8 = vector.shape_cast %7 : vector<128xf32> to vector<1x128xf32>
    %9 = arith.addf %0, %8 : vector<1x128xf32>
    %10 = arith.mulf %4, %4 : vector<32x128xf32>
    %cst_8 = arith.constant dense<0.000000e+00> : vector<128xf32>
    %11 = vector.multi_reduction <add>, %10, %cst_8 [0] : vector<32x128xf32> to vector<128xf32>
    %12 = vector.shape_cast %11 : vector<128xf32> to vector<1x128xf32>
    %13 = arith.addf %1, %12 : vector<1x128xf32>
    %cst_9 = arith.constant 0.000000e+00 : f32
    %14 = vector.broadcast %cst_9 : f32 to vector<1x8x128xf32>
    %c0_10 = arith.constant 0 : index
    %c0_11 = arith.constant 0 : index
    %c0_12 = arith.constant 0 : index
    %15 = vector.load %arg4[%c0_10, %c0_11, %c0_12] : memref<1x8x128xf32, #tpu.memory_space<vmem>>, vector<1x8x128xf32>
    tpu.vector_store %arg4[%c0_10, %c0_11, %c0_12], %14 {strides = array<i32>} : memref<1x8x128xf32, #tpu.memory_space<vmem>>, vector<1x8x128xf32>,
    %16 = vector.shape_cast %9 : vector<1x128xf32> to vector<1x1x128xf32>
    %c0_13 = arith.constant 0 : index
    %c0_14 = arith.constant 0 : index
    %c0_15 = arith.constant 0 : index
    %17 = vector.load %arg4[%c0_13, %c0_14, %c0_15] : memref<1x8x128xf32, #tpu.memory_space<vmem>>, vector<1x1x128xf32>
    tpu.vector_store %arg4[%c0_13, %c0_14, %c0_15], %16 {strides = array<i32>} : memref<1x8x128xf32, #tpu.memory_space<vmem>>, vector<1x1x128xf32>,
    %18 = vector.shape_cast %13 : vector<1x128xf32> to vector<1x1x128xf32>
    %c0_16 = arith.constant 0 : index
    %c1 = arith.constant 1 : index
    %c0_17 = arith.constant 0 : index
    %19 = vector.load %arg4[%c0_16, %c1, %c0_17] : memref<1x8x128xf32, #tpu.memory_space<vmem>>, vector<1x1x128xf32>
    tpu.vector_store %arg4[%c0_16, %c1, %c0_17], %18 {strides = array<i32>} : memref<1x8x128xf32, #tpu.memory_space<vmem>>, vector<1x1x128xf32>,
    return
  }
  func.func @transform_0(%arg0: i32) -> (i32, i32) {
    %c0_i32 = arith.constant 0 : i32
    %c0_i32_0 = arith.constant 0 : i32
    return %arg0, %c0_i32 : i32, i32
  }
  func.func @transform_1(%arg0: i32) -> (i32, i32) {
    %c0_i32 = arith.constant 0 : i32
    %c0_i32_0 = arith.constant 0 : i32
    %c0_i32_1 = arith.constant 0 : i32
    return %c0_i32, %c0_i32_0 : i32, i32
  }
  func.func @transform_2(%arg0: i32) -> (i32, i32) {
    %c0_i32 = arith.constant 0 : i32
    %c0_i32_0 = arith.constant 0 : i32
    return %arg0, %c0_i32 : i32, i32
  }
  func.func @transform_3(%arg0: i32) -> (i32, i32, i32) {
    %c0_i32 = arith.constant 0 : i32
    %c0_i32_0 = arith.constant 0 : i32
    %c0_i32_1 = arith.constant 0 : i32
    return %arg0, %c0_i32, %c0_i32_0 : i32, i32, i32
  }
}

module attributes {stable_mosaic.version = 11 : i64} {
  func.func @_conv_stats_kernel(%arg0: i32, %arg1: memref<32x1152xbf16, #tpu.memory_space<vmem>>, %arg2: memref<1152x128xbf16, #tpu.memory_space<vmem>>, %arg3: memref<1x1152xf32, #tpu.memory_space<vmem>>, %arg4: memref<1x1152xf32, #tpu.memory_space<vmem>>, %arg5: memref<32x128xbf16, #tpu.memory_space<vmem>>, %arg6: memref<1x8x128xf32, #tpu.memory_space<vmem>>, %arg7: memref<2x32x1152xbf16, #tpu.memory_space<vmem>>) attributes {dimension_semantics = [#tpu.dimension_semantics<parallel>], iteration_bounds = array<i64: 1>, scalar_prefetch = 0 : i64, scratch_operands = 1 : i64, tpu.core_type = #tpu.core_type<tc>, window_params = [{transform_indices = @transform_0, window_bounds = array<i64: 32, 1152>}, {pipeline_mode = #tpu.pipeline_mode<synchronous>, transform_indices = @transform_1, window_bounds = array<i64: 1152, 128>}, {pipeline_mode = #tpu.pipeline_mode<synchronous>, transform_indices = @transform_2, window_bounds = array<i64: 1, 1152>}, {pipeline_mode = #tpu.pipeline_mode<synchronous>, transform_indices = @transform_3, window_bounds = array<i64: 1, 1152>}, {transform_indices = @transform_4, window_bounds = array<i64: 32, 128>}, {transform_indices = @transform_5, window_bounds = array<i64: 1, 8, 128>}]} {
    %cst = arith.constant 0.000000e+00 : f32
    %0 = vector.broadcast %cst : f32 to vector<1x128xf32>
    %cst_0 = arith.constant 0.000000e+00 : f32
    %1 = vector.broadcast %cst_0 : f32 to vector<1x128xf32>
    %c0 = arith.constant 0 : index
    %c0_1 = arith.constant 0 : index
    %2 = vector.load %arg1[%c0, %c0_1] : memref<32x1152xbf16, #tpu.memory_space<vmem>>, vector<32x1152xbf16>
    %3 = arith.extf %2 : vector<32x1152xbf16> to vector<32x1152xf32>
    %c0_2 = arith.constant 0 : index
    %c0_3 = arith.constant 0 : index
    %4 = vector.load %arg3[%c0_2, %c0_3] : memref<1x1152xf32, #tpu.memory_space<vmem>>, vector<1x1152xf32>
    %5 = vector.broadcast %4 : vector<1x1152xf32> to vector<32x1152xf32>
    %6 = arith.mulf %3, %5 : vector<32x1152xf32>
    %c0_4 = arith.constant 0 : index
    %c0_5 = arith.constant 0 : index
    %7 = vector.load %arg4[%c0_4, %c0_5] : memref<1x1152xf32, #tpu.memory_space<vmem>>, vector<1x1152xf32>
    %8 = vector.broadcast %7 : vector<1x1152xf32> to vector<32x1152xf32>
    %9 = arith.addf %6, %8 : vector<32x1152xf32>
    %cst_6 = arith.constant 0.000000e+00 : f32
    %10 = vector.broadcast %cst_6 : f32 to vector<32x1152xf32>
    %11 = arith.maximumf %9, %10 : vector<32x1152xf32>
    %12 = arith.truncf %11 : vector<32x1152xf32> to vector<32x1152xbf16>
    %c0_7 = arith.constant 0 : index
    %c0_8 = arith.constant 0 : index
    %c0_9 = arith.constant 0 : index
    %13 = vector.load %arg7[%c0_7, %c0_8, %c0_9] : memref<2x32x1152xbf16, #tpu.memory_space<vmem>>, vector<1x32x1152xbf16>
    %14 = vector.shape_cast %13 : vector<1x32x1152xbf16> to vector<32x1152xbf16>
    %15 = vector.shape_cast %12 : vector<32x1152xbf16> to vector<1x32x1152xbf16>
    tpu.vector_store %arg7[%c0_7, %c0_8, %c0_9], %15 {strides = array<i32>} : memref<2x32x1152xbf16, #tpu.memory_space<vmem>>, vector<1x32x1152xbf16>,
    %c0_10 = arith.constant 0 : index
    %c0_11 = arith.constant 0 : index
    %c0_12 = arith.constant 0 : index
    %16 = vector.load %arg7[%c0_10, %c0_11, %c0_12] : memref<2x32x1152xbf16, #tpu.memory_space<vmem>>, vector<1x32x1152xbf16>
    %17 = vector.shape_cast %16 : vector<1x32x1152xbf16> to vector<32x1152xbf16>
    %c0_13 = arith.constant 0 : index
    %c0_14 = arith.constant 0 : index
    %18 = vector.load %arg2[%c0_13, %c0_14] : memref<1152x128xbf16, #tpu.memory_space<vmem>>, vector<1152x128xbf16>
    %cst_15 = arith.constant dense<0.000000e+00> : vector<32x128xf32>
    %19 = tpu.matmul %17, %18, %cst_15 {dimension_numbers = #tpu.dot_dimension_numbers<[1], [0], [0], [1], [0, 0, 1, 1], [], []>} : vector<32x1152xbf16>, vector<1152x128xbf16>, vector<32x128xf32> -> vector<32x128xf32>
    %20 = arith.truncf %19 : vector<32x128xf32> to vector<32x128xbf16>
    %c0_16 = arith.constant 0 : index
    %c0_17 = arith.constant 0 : index
    %21 = vector.load %arg5[%c0_16, %c0_17] : memref<32x128xbf16, #tpu.memory_space<vmem>>, vector<32x128xbf16>
    tpu.vector_store %arg5[%c0_16, %c0_17], %20 {strides = array<i32>} : memref<32x128xbf16, #tpu.memory_space<vmem>>, vector<32x128xbf16>,
    %cst_18 = arith.constant dense<0.000000e+00> : vector<128xf32>
    %22 = vector.multi_reduction <add>, %19, %cst_18 [0] : vector<32x128xf32> to vector<128xf32>
    %23 = vector.shape_cast %22 : vector<128xf32> to vector<1x128xf32>
    %24 = arith.addf %0, %23 : vector<1x128xf32>
    %25 = arith.mulf %19, %19 : vector<32x128xf32>
    %cst_19 = arith.constant dense<0.000000e+00> : vector<128xf32>
    %26 = vector.multi_reduction <add>, %25, %cst_19 [0] : vector<32x128xf32> to vector<128xf32>
    %27 = vector.shape_cast %26 : vector<128xf32> to vector<1x128xf32>
    %28 = arith.addf %1, %27 : vector<1x128xf32>
    %cst_20 = arith.constant 0.000000e+00 : f32
    %29 = vector.broadcast %cst_20 : f32 to vector<1x8x128xf32>
    %c0_21 = arith.constant 0 : index
    %c0_22 = arith.constant 0 : index
    %c0_23 = arith.constant 0 : index
    %30 = vector.load %arg6[%c0_21, %c0_22, %c0_23] : memref<1x8x128xf32, #tpu.memory_space<vmem>>, vector<1x8x128xf32>
    tpu.vector_store %arg6[%c0_21, %c0_22, %c0_23], %29 {strides = array<i32>} : memref<1x8x128xf32, #tpu.memory_space<vmem>>, vector<1x8x128xf32>,
    %31 = vector.shape_cast %24 : vector<1x128xf32> to vector<1x1x128xf32>
    %c0_24 = arith.constant 0 : index
    %c0_25 = arith.constant 0 : index
    %c0_26 = arith.constant 0 : index
    %32 = vector.load %arg6[%c0_24, %c0_25, %c0_26] : memref<1x8x128xf32, #tpu.memory_space<vmem>>, vector<1x1x128xf32>
    tpu.vector_store %arg6[%c0_24, %c0_25, %c0_26], %31 {strides = array<i32>} : memref<1x8x128xf32, #tpu.memory_space<vmem>>, vector<1x1x128xf32>,
    %33 = vector.shape_cast %28 : vector<1x128xf32> to vector<1x1x128xf32>
    %c0_27 = arith.constant 0 : index
    %c1 = arith.constant 1 : index
    %c0_28 = arith.constant 0 : index
    %34 = vector.load %arg6[%c0_27, %c1, %c0_28] : memref<1x8x128xf32, #tpu.memory_space<vmem>>, vector<1x1x128xf32>
    tpu.vector_store %arg6[%c0_27, %c1, %c0_28], %33 {strides = array<i32>} : memref<1x8x128xf32, #tpu.memory_space<vmem>>, vector<1x1x128xf32>,
    return
  }
  func.func @transform_0(%arg0: i32) -> (i32, i32) {
    %c0_i32 = arith.constant 0 : i32
    %c0_i32_0 = arith.constant 0 : i32
    return %arg0, %c0_i32 : i32, i32
  }
  func.func @transform_1(%arg0: i32) -> (i32, i32) {
    %c0_i32 = arith.constant 0 : i32
    %c0_i32_0 = arith.constant 0 : i32
    %c0_i32_1 = arith.constant 0 : i32
    return %c0_i32, %c0_i32_0 : i32, i32
  }
  func.func @transform_2(%arg0: i32) -> (i32, i32) {
    %c0_i32 = arith.constant 0 : i32
    %c0_i32_0 = arith.constant 0 : i32
    %c0_i32_1 = arith.constant 0 : i32
    return %c0_i32, %c0_i32_0 : i32, i32
  }
  func.func @transform_3(%arg0: i32) -> (i32, i32) {
    %c0_i32 = arith.constant 0 : i32
    %c0_i32_0 = arith.constant 0 : i32
    %c0_i32_1 = arith.constant 0 : i32
    return %c0_i32, %c0_i32_0 : i32, i32
  }
  func.func @transform_4(%arg0: i32) -> (i32, i32) {
    %c0_i32 = arith.constant 0 : i32
    %c0_i32_0 = arith.constant 0 : i32
    return %arg0, %c0_i32 : i32, i32
  }
  func.func @transform_5(%arg0: i32) -> (i32, i32, i32) {
    %c0_i32 = arith.constant 0 : i32
    %c0_i32_0 = arith.constant 0 : i32
    %c0_i32_1 = arith.constant 0 : i32
    return %arg0, %c0_i32, %c0_i32_0 : i32, i32, i32
  }
}

module attributes {stable_mosaic.version = 11 : i64} {
  func.func @_bn_apply_res_kernel(%arg0: i32, %arg1: memref<32x128xbf16, #tpu.memory_space<vmem>>, %arg2: memref<1x128xf32, #tpu.memory_space<vmem>>, %arg3: memref<1x128xf32, #tpu.memory_space<vmem>>, %arg4: memref<32x128xbf16, #tpu.memory_space<vmem>>, %arg5: memref<32x128xbf16, #tpu.memory_space<vmem>>) attributes {dimension_semantics = [#tpu.dimension_semantics<parallel>], iteration_bounds = array<i64: 1>, scalar_prefetch = 0 : i64, scratch_operands = 0 : i64, tpu.core_type = #tpu.core_type<tc>, window_params = [{transform_indices = @transform_0, window_bounds = array<i64: 32, 128>}, {pipeline_mode = #tpu.pipeline_mode<synchronous>, transform_indices = @transform_1, window_bounds = array<i64: 1, 128>}, {pipeline_mode = #tpu.pipeline_mode<synchronous>, transform_indices = @transform_2, window_bounds = array<i64: 1, 128>}, {transform_indices = @transform_3, window_bounds = array<i64: 32, 128>}, {transform_indices = @transform_4, window_bounds = array<i64: 32, 128>}]} {
    %c0 = arith.constant 0 : index
    %c0_0 = arith.constant 0 : index
    %0 = vector.load %arg1[%c0, %c0_0] : memref<32x128xbf16, #tpu.memory_space<vmem>>, vector<32x128xbf16>
    %1 = arith.extf %0 : vector<32x128xbf16> to vector<32x128xf32>
    %c0_1 = arith.constant 0 : index
    %c0_2 = arith.constant 0 : index
    %2 = vector.load %arg2[%c0_1, %c0_2] : memref<1x128xf32, #tpu.memory_space<vmem>>, vector<1x128xf32>
    %3 = vector.broadcast %2 : vector<1x128xf32> to vector<32x128xf32>
    %4 = arith.mulf %1, %3 : vector<32x128xf32>
    %c0_3 = arith.constant 0 : index
    %c0_4 = arith.constant 0 : index
    %5 = vector.load %arg3[%c0_3, %c0_4] : memref<1x128xf32, #tpu.memory_space<vmem>>, vector<1x128xf32>
    %6 = vector.broadcast %5 : vector<1x128xf32> to vector<32x128xf32>
    %7 = arith.addf %4, %6 : vector<32x128xf32>
    %c0_5 = arith.constant 0 : index
    %c0_6 = arith.constant 0 : index
    %8 = vector.load %arg4[%c0_5, %c0_6] : memref<32x128xbf16, #tpu.memory_space<vmem>>, vector<32x128xbf16>
    %9 = arith.extf %8 : vector<32x128xbf16> to vector<32x128xf32>
    %10 = arith.addf %7, %9 : vector<32x128xf32>
    %cst = arith.constant 0.000000e+00 : f32
    %11 = vector.broadcast %cst : f32 to vector<32x128xf32>
    %12 = arith.maximumf %10, %11 : vector<32x128xf32>
    %13 = arith.truncf %12 : vector<32x128xf32> to vector<32x128xbf16>
    %c0_7 = arith.constant 0 : index
    %c0_8 = arith.constant 0 : index
    %14 = vector.load %arg5[%c0_7, %c0_8] : memref<32x128xbf16, #tpu.memory_space<vmem>>, vector<32x128xbf16>
    tpu.vector_store %arg5[%c0_7, %c0_8], %13 {strides = array<i32>} : memref<32x128xbf16, #tpu.memory_space<vmem>>, vector<32x128xbf16>,
    return
  }
  func.func @transform_0(%arg0: i32) -> (i32, i32) {
    %c0_i32 = arith.constant 0 : i32
    %c0_i32_0 = arith.constant 0 : i32
    return %arg0, %c0_i32 : i32, i32
  }
  func.func @transform_1(%arg0: i32) -> (i32, i32) {
    %c0_i32 = arith.constant 0 : i32
    %c0_i32_0 = arith.constant 0 : i32
    %c0_i32_1 = arith.constant 0 : i32
    return %c0_i32, %c0_i32_0 : i32, i32
  }
  func.func @transform_2(%arg0: i32) -> (i32, i32) {
    %c0_i32 = arith.constant 0 : i32
    %c0_i32_0 = arith.constant 0 : i32
    %c0_i32_1 = arith.constant 0 : i32
    return %c0_i32, %c0_i32_0 : i32, i32
  }
  func.func @transform_3(%arg0: i32) -> (i32, i32) {
    %c0_i32 = arith.constant 0 : i32
    %c0_i32_0 = arith.constant 0 : i32
    return %arg0, %c0_i32 : i32, i32
  }
  func.func @transform_4(%arg0: i32) -> (i32, i32) {
    %c0_i32 = arith.constant 0 : i32
    %c0_i32_0 = arith.constant 0 : i32
    return %arg0, %c0_i32 : i32, i32
  }
}

module attributes {stable_mosaic.version = 11 : i64} {
  func.func @_conv_stats_kernel(%arg0: i32, %arg1: memref<32x1152xbf16, #tpu.memory_space<vmem>>, %arg2: memref<1152x128xbf16, #tpu.memory_space<vmem>>, %arg3: memref<32x128xbf16, #tpu.memory_space<vmem>>, %arg4: memref<1x8x128xf32, #tpu.memory_space<vmem>>) attributes {dimension_semantics = [#tpu.dimension_semantics<parallel>], iteration_bounds = array<i64: 1>, scalar_prefetch = 0 : i64, scratch_operands = 0 : i64, tpu.core_type = #tpu.core_type<tc>, window_params = [{transform_indices = @transform_0, window_bounds = array<i64: 32, 1152>}, {pipeline_mode = #tpu.pipeline_mode<synchronous>, transform_indices = @transform_1, window_bounds = array<i64: 1152, 128>}, {transform_indices = @transform_2, window_bounds = array<i64: 32, 128>}, {transform_indices = @transform_3, window_bounds = array<i64: 1, 8, 128>}]} {
    %cst = arith.constant 0.000000e+00 : f32
    %0 = vector.broadcast %cst : f32 to vector<1x128xf32>
    %cst_0 = arith.constant 0.000000e+00 : f32
    %1 = vector.broadcast %cst_0 : f32 to vector<1x128xf32>
    %c0 = arith.constant 0 : index
    %c0_1 = arith.constant 0 : index
    %2 = vector.load %arg1[%c0, %c0_1] : memref<32x1152xbf16, #tpu.memory_space<vmem>>, vector<32x1152xbf16>
    %c0_2 = arith.constant 0 : index
    %c0_3 = arith.constant 0 : index
    %3 = vector.load %arg2[%c0_2, %c0_3] : memref<1152x128xbf16, #tpu.memory_space<vmem>>, vector<1152x128xbf16>
    %cst_4 = arith.constant dense<0.000000e+00> : vector<32x128xf32>
    %4 = tpu.matmul %2, %3, %cst_4 {dimension_numbers = #tpu.dot_dimension_numbers<[1], [0], [0], [1], [0, 0, 1, 1], [], []>} : vector<32x1152xbf16>, vector<1152x128xbf16>, vector<32x128xf32> -> vector<32x128xf32>
    %5 = arith.truncf %4 : vector<32x128xf32> to vector<32x128xbf16>
    %c0_5 = arith.constant 0 : index
    %c0_6 = arith.constant 0 : index
    %6 = vector.load %arg3[%c0_5, %c0_6] : memref<32x128xbf16, #tpu.memory_space<vmem>>, vector<32x128xbf16>
    tpu.vector_store %arg3[%c0_5, %c0_6], %5 {strides = array<i32>} : memref<32x128xbf16, #tpu.memory_space<vmem>>, vector<32x128xbf16>,
    %cst_7 = arith.constant dense<0.000000e+00> : vector<128xf32>
    %7 = vector.multi_reduction <add>, %4, %cst_7 [0] : vector<32x128xf32> to vector<128xf32>
    %8 = vector.shape_cast %7 : vector<128xf32> to vector<1x128xf32>
    %9 = arith.addf %0, %8 : vector<1x128xf32>
    %10 = arith.mulf %4, %4 : vector<32x128xf32>
    %cst_8 = arith.constant dense<0.000000e+00> : vector<128xf32>
    %11 = vector.multi_reduction <add>, %10, %cst_8 [0] : vector<32x128xf32> to vector<128xf32>
    %12 = vector.shape_cast %11 : vector<128xf32> to vector<1x128xf32>
    %13 = arith.addf %1, %12 : vector<1x128xf32>
    %cst_9 = arith.constant 0.000000e+00 : f32
    %14 = vector.broadcast %cst_9 : f32 to vector<1x8x128xf32>
    %c0_10 = arith.constant 0 : index
    %c0_11 = arith.constant 0 : index
    %c0_12 = arith.constant 0 : index
    %15 = vector.load %arg4[%c0_10, %c0_11, %c0_12] : memref<1x8x128xf32, #tpu.memory_space<vmem>>, vector<1x8x128xf32>
    tpu.vector_store %arg4[%c0_10, %c0_11, %c0_12], %14 {strides = array<i32>} : memref<1x8x128xf32, #tpu.memory_space<vmem>>, vector<1x8x128xf32>,
    %16 = vector.shape_cast %9 : vector<1x128xf32> to vector<1x1x128xf32>
    %c0_13 = arith.constant 0 : index
    %c0_14 = arith.constant 0 : index
    %c0_15 = arith.constant 0 : index
    %17 = vector.load %arg4[%c0_13, %c0_14, %c0_15] : memref<1x8x128xf32, #tpu.memory_space<vmem>>, vector<1x1x128xf32>
    tpu.vector_store %arg4[%c0_13, %c0_14, %c0_15], %16 {strides = array<i32>} : memref<1x8x128xf32, #tpu.memory_space<vmem>>, vector<1x1x128xf32>,
    %18 = vector.shape_cast %13 : vector<1x128xf32> to vector<1x1x128xf32>
    %c0_16 = arith.constant 0 : index
    %c1 = arith.constant 1 : index
    %c0_17 = arith.constant 0 : index
    %19 = vector.load %arg4[%c0_16, %c1, %c0_17] : memref<1x8x128xf32, #tpu.memory_space<vmem>>, vector<1x1x128xf32>
    tpu.vector_store %arg4[%c0_16, %c1, %c0_17], %18 {strides = array<i32>} : memref<1x8x128xf32, #tpu.memory_space<vmem>>, vector<1x1x128xf32>,
    return
  }
  func.func @transform_0(%arg0: i32) -> (i32, i32) {
    %c0_i32 = arith.constant 0 : i32
    %c0_i32_0 = arith.constant 0 : i32
    return %arg0, %c0_i32 : i32, i32
  }
  func.func @transform_1(%arg0: i32) -> (i32, i32) {
    %c0_i32 = arith.constant 0 : i32
    %c0_i32_0 = arith.constant 0 : i32
    %c0_i32_1 = arith.constant 0 : i32
    return %c0_i32, %c0_i32_0 : i32, i32
  }
  func.func @transform_2(%arg0: i32) -> (i32, i32) {
    %c0_i32 = arith.constant 0 : i32
    %c0_i32_0 = arith.constant 0 : i32
    return %arg0, %c0_i32 : i32, i32
  }
  func.func @transform_3(%arg0: i32) -> (i32, i32, i32) {
    %c0_i32 = arith.constant 0 : i32
    %c0_i32_0 = arith.constant 0 : i32
    %c0_i32_1 = arith.constant 0 : i32
    return %arg0, %c0_i32, %c0_i32_0 : i32, i32, i32
  }
}

</mosaic_0001>

<bundles_post_ra>
// kernel: resnet34_3_forward.15
= control target key start
LH: loop header
LB: loop body
LE: loop exit
PB: predicated region body
PF: predicated region fallthrough
CT: control target
= control target key end

     0   :  { %s110_s0 = inlined_call_operand.vmem [shape: bf16[32,128], index: 0, kind: input, shape index: {}]   ;;  %s111_s1 = inlined_call_operand.vmem [shape: f32[1,128], index: 1, kind: input, shape index: {}]   ;;  %s112_s2 = inlined_call_operand.vmem [shape: f32[1,128], index: 2, kind: input, shape index: {}]   ;;  %s113_s3 = inlined_call_operand.vmem [shape: bf16[32,128], index: 3, kind: output, shape index: {}]  }
   0x1   :  { %v51_v0 = vld [vmem:[%s110_s0] sm:$0xff]   ;;  %v68_v5 = vld [vmem:[%s110_s0 + $0x8] sm:$0xff]  }
   0x2   :  { %v70_v1 = vld [vmem:[%s111_s1] ss:$0 sm:$0xff]  ;;  %v52_v2 = vunpack.c.l.bf16 %v51_v0  ;;  %v53_v3 = vunpack.c.h.bf16 %v51_v0  ;;  %v56_v6 = vunpack.c.l.bf16 %v68_v5  ;;  %v57_v7 = vunpack.c.h.bf16 %v68_v5 }
   0x3   :  { %v71_v4 = vld [vmem:[%s112_s2] ss:$0 sm:$0xff] }
   0x4   :  { %v26_v8 = vmul.f32 %v70_v1, %v52_v2  ;;  %v27_v9 = vmul.f32 %v70_v1, %v53_v3  ;;  %v28_v10 = vmul.f32 %v70_v1, %v56_v6  ;;  %v29_v11 = vmul.f32 %v70_v1, %v57_v7 }
   0x6   :  { %v34_v12 = vadd.f32 %v71_v4, %v26_v8  ;;  %v35_v13 = vadd.f32 %v71_v4, %v27_v9  ;;  %v36_v14 = vadd.f32 %v71_v4, %v28_v10  ;;  %v37_v15 = vadd.f32 %v71_v4, %v29_v11 }
   0x8   :  { %v61_v16 = vpack.c.bf16 %v35_v13, %v34_v12  ;;  %v66_v17 = vpack.c.bf16 %v37_v15, %v36_v14 }
   0xa   :  { %62 = vst [vmem:[%s113_s3] sm:$0xff] %v61_v16  }
   0xb   :  { %69 = vst [vmem:[%s113_s3 + $0x8] sm:$0xff] %v66_v17  }

// kernel: resnet34_3_forward.14
= control target key start
LH: loop header
LB: loop body
LE: loop exit
PB: predicated region body
PF: predicated region fallthrough
CT: control target
= control target key end

     0   :  { %vm60_vm0 = vcmask 523264   ;;  %v177_v6 = vmov 0.0   ;;  %s231_s1 = inlined_call_operand.vmem [shape: bf16[64,128], index: 1, kind: input, shape index: {}]   ;;  %s232_s0 = inlined_call_operand.vmem [shape: bf16[32,64], index: 0, kind: input, shape index: {}]   ;;  %s233_s3 = inlined_call_operand.vmem [shape: f32[1,8,128], index: 3, kind: output, shape index: {1}]   ;;  %s234_s2 = inlined_call_operand.vmem [shape: bf16[32,128], index: 2, kind: output, shape index: {0}]  }
   0x1   :  { %v160_v0 = vld [vmem:[%s231_s1 + $0x18] sm:$0xff]  ;;  %v159_v1 = vld [vmem:[%s231_s1 + $0x10] sm:$0xff]  ;;  %v158_v2 = vld [vmem:[%s231_s1 + $0x8] sm:$0xff]  ;;  %118 = vst [vmem:[%s233_s3] sm:$0xff] %v177_v6 }
   0x2   :  { %71 = vmatpush.bf16.msra.mxu0 %v160_v0  ;;  %172 = vmatpush.bf16.msra.mxu1 %v160_v0  ;;  %v157_v3 = vld [vmem:[%s231_s1] sm:$0xff]  ;;  %v156_v5 = vld [vmem:[%s232_s0 + $0x8] sm:$0xff] }
   0x3   :  { %v155_v4 = vld [vmem:[%s232_s0] sm:$0xff] }
   0x6   :  { %72 = vmatpush.bf16.msra.mxu0 %v159_v1  ;;  %173 = vmatpush.bf16.msra.mxu1 %v159_v1 }
   0xa   :  { %73 = vmatpush.bf16.msra.mxu0 %v158_v2  ;;  %174 = vmatpush.bf16.msra.mxu1 %v158_v2 }
   0xe   :  { %74 = vmatpush.bf16.msra.mxu0 %v157_v3  ;;  %175 = vmatpush.bf16.msra.mxu1 %v157_v3 }
  0x11   :  { %153 = vmatmul.msk.bf16.vlgmr.msra.gmra.mxu0 %vm60_vm0, %v155_v4  ;;  %154 = vmatmul.msk.bf16.vlgmr.msra.gmra.mxu1 %vm60_vm0, %v156_v5 }
  0x8e   :  { %v76_v7 = vpop.f32.mrf.mxu0  ;;  %v81_v8 = vpop.f32.mrf.mxu1 }
  0x8f   :  { %v104_v9 = vmul.f32 %v76_v7, %v76_v7  ;;  %v106_v16 = vmul.f32 %v81_v8, %v81_v8 }
  0x96   :  { %v78_v10 = vpop.f32.mrf.mxu0  ;;  %v83_v11 = vpop.f32.mrf.mxu1 }
  0x97   :  { %v164_v12 = vpack.c.bf16 %v78_v10, %v76_v7  ;;  %v94_v13 = vadd.f32 %v78_v10, %v76_v7  ;;  %v105_v14 = vmul.f32 %v78_v10, %v78_v10  ;;  %v169_v15 = vpack.c.bf16 %v83_v11, %v81_v8 }
  0x98   :  { %v107_v20 = vmul.f32 %v83_v11, %v83_v11 }
  0x99   :  { %165 = vst [vmem:[%s234_s2] sm:$0xff] %v164_v12   ;;  %v108_v17 = vadd.f32 %v105_v14, %v104_v9  ;;  %v95_v18 = vadd.f32 %v94_v13, %v81_v8 }
  0x9a   :  { %171 = vst [vmem:[%s234_s2 + $0x8] sm:$0xff] %v169_v15  }
  0x9b   :  { %v96_v19 = vadd.f32 %v95_v18, %v83_v11  ;;  %v109_v21 = vadd.f32 %v108_v17, %v106_v16 }
  0x9d   :  { %v97_v22 = vrot.slane %v96_v19, 4  ;;  %v110_v23 = vadd.f32 %v109_v21, %v107_v20 }
  0x9f   :  { %v98_v24 = vadd.f32 %v97_v22, %v96_v19  ;;  %v111_v25 = vrot.slane %v110_v23, 4 }
  0xa1   :  { %v99_v26 = vrot.slane %v98_v24, 2  ;;  %v112_v27 = vadd.f32 %v111_v25, %v110_v23 }
  0xa3   :  { %v100_v28 = vadd.f32 %v99_v26, %v98_v24  ;;  %v113_v29 = vrot.slane %v112_v27, 2 }
  0xa5   :  { %v101_v30 = vrot.slane %v100_v28, 1  ;;  %v114_v31 = vadd.f32 %v113_v29, %v112_v27 }
  0xa7   :  { %v102_v32 = vadd.f32 %v101_v30, %v100_v28  ;;  %v115_v33 = vrot.slane %v114_v31, 1 }
  0xa9   :  { %v116_v34 = vadd.f32 %v115_v33, %v114_v31  ;;  %119 = vst [vmem:[%s233_s3] sm:$0x1] %v102_v32 }
  0xab   :  { %120 = vst [vmem:[%s233_s3 + $0x1] sm:$0x1] %v116_v34 }

// kernel: resnet34_3_forward.16
= control target key start
LH: loop header
LB: loop body
LE: loop exit
PB: predicated region body
PF: predicated region fallthrough
CT: control target
= control target key end

     0   :  { %vm364_vm0 = vcmask 523264   ;;  %s961_s1 = inlined_call_operand.vmem [shape: bf16[576,128], index: 1, kind: input, shape index: {}]   ;;  %s962_s0 = inlined_call_operand.vmem [shape: bf16[32,576], index: 0, kind: input, shape index: {}]   ;;  %s963_s3 = inlined_call_operand.vmem [shape: f32[1,8,128], index: 3, kind: output, shape index: {1}]   ;;  %s964_s2 = inlined_call_operand.vmem [shape: bf16[32,128], index: 2, kind: output, shape index: {0}]  }
   0x1   :  { %v712_v0 = vld [vmem:[%s961_s1 + $0x38] sm:$0xff]  ;;  %v711_v4 = vld [vmem:[%s961_s1 + $0x30] sm:$0xff]  ;;  %v710_v8 = vld [vmem:[%s961_s1 + $0x28] sm:$0xff] }
   0x2   :  { %v720_v1 = vld [vmem:[%s961_s1 + $0x78] sm:$0xff]  ;;  %371 = vmatpush.bf16.msra.mxu0 %v712_v0  ;;  %v719_v5 = vld [vmem:[%s961_s1 + $0x70] sm:$0xff]  ;;  %v718_v9 = vld [vmem:[%s961_s1 + $0x68] sm:$0xff] }
   0x3   :  { %v728_v2 = vld [vmem:[%s961_s1 + $0xb8] sm:$0xff]  ;;  %390 = vmatpush.bf16.msra.mxu1 %v720_v1  ;;  %v727_v6 = vld [vmem:[%s961_s1 + $0xb0] sm:$0xff]  ;;  %v726_v10 = vld [vmem:[%s961_s1 + $0xa8] sm:$0xff] }
   0x4   :  { %v736_v3 = vld [vmem:[%s961_s1 + $0xf8] sm:$0xff]  ;;  %409 = vmatpush.bf16.msra.mxu2 %v728_v2  ;;  %v735_v7 = vld [vmem:[%s961_s1 + $0xf0] sm:$0xff]  ;;  %v734_v11 = vld [vmem:[%s961_s1 + $0xe8] sm:$0xff] }
   0x5   :  { %428 = vmatpush.bf16.msra.mxu3 %v736_v3  ;;  %v709_v12 = vld [vmem:[%s961_s1 + $0x20] sm:$0xff]  ;;  %v708_v16 = vld [vmem:[%s961_s1 + $0x18] sm:$0xff]  ;;  %v707_v20 = vld [vmem:[%s961_s1 + $0x10] sm:$0xff] }
   0x6   :  { %372 = vmatpush.bf16.msra.mxu0 %v711_v4  ;;  %v717_v13 = vld [vmem:[%s961_s1 + $0x60] sm:$0xff]  ;;  %v716_v17 = vld [vmem:[%s961_s1 + $0x58] sm:$0xff]  ;;  %v715_v21 = vld [vmem:[%s961_s1 + $0x50] sm:$0xff] }
   0x7   :  { %391 = vmatpush.bf16.msra.mxu1 %v719_v5  ;;  %v725_v14 = vld [vmem:[%s961_s1 + $0xa0] sm:$0xff]  ;;  %v724_v18 = vld [vmem:[%s961_s1 + $0x98] sm:$0xff]  ;;  %v723_v22 = vld [vmem:[%s961_s1 + $0x90] sm:$0xff] }
   0x8   :  { %410 = vmatpush.bf16.msra.mxu2 %v727_v6  ;;  %v733_v15 = vld [vmem:[%s961_s1 + $0xe0] sm:$0xff]  ;;  %v732_v19 = vld [vmem:[%s961_s1 + $0xd8] sm:$0xff]  ;;  %v731_v23 = vld [vmem:[%s961_s1 + $0xd0] sm:$0xff] }
   0x9   :  { %429 = vmatpush.bf16.msra.mxu3 %v735_v7  ;;  %v706_v24 = vld [vmem:[%s961_s1 + $0x8] sm:$0xff]  ;;  %v705_v28 = vld [vmem:[%s961_s1] sm:$0xff]  ;;  %v697_v33 = vld [vmem:[%s962_s0 + $0x10] sm:$0xf0] }
   0xa   :  { %373 = vmatpush.bf16.msra.mxu0 %v710_v8  ;;  %v714_v25 = vld [vmem:[%s961_s1 + $0x48] sm:$0xff]  ;;  %v713_v29 = vld [vmem:[%s961_s1 + $0x40] sm:$0xff]  ;;  %v513_v35 = vld [vmem:[%s962_s0 + $0x14] sm:$0xf0] }
   0xb   :  { %392 = vmatpush.bf16.msra.mxu1 %v718_v9  ;;  %v722_v26 = vld [vmem:[%s961_s1 + $0x88] sm:$0xff]  ;;  %v721_v30 = vld [vmem:[%s961_s1 + $0x80] sm:$0xff]  ;;  %v698_v37 = vld [vmem:[%s962_s0 + $0x18] sm:$0xf0] }
   0xc   :  { %411 = vmatpush.bf16.msra.mxu2 %v726_v10  ;;  %v730_v27 = vld [vmem:[%s961_s1 + $0xc8] sm:$0xff]  ;;  %v729_v31 = vld [vmem:[%s961_s1 + $0xc0] sm:$0xff]  ;;  %v740_v40 = vld [vmem:[%s961_s1 + $0x118] sm:$0xff] }
   0xd   :  { %430 = vmatpush.bf16.msra.mxu3 %v734_v11  ;;  %v511_v32 = vld [vmem:[%s962_s0] sm:$0xf]  ;;  %v695_v34 = vld [vmem:[%s962_s0 + $0x4] sm:$0xf]  ;;  %v519_v36 = vld [vmem:[%s962_s0 + $0x8] sm:$0xf] }
   0xe   :  { %374 = vmatpush.bf16.msra.mxu0 %v709_v12  ;;  %v696_v38 = vld [vmem:[%s962_s0 + $0xc] sm:$0xf]  ;;  %v521_v39 = vld [vmem:[%s962_s0 + $0x1c] sm:$0xf0]  ;;  %v512_v41 = vor.u32 %v697_v33, %v511_v32  ;;  %v516_v42 = vor.u32 %v695_v34, %v513_v35  ;;  %v520_v43 = vor.u32 %v698_v37, %v519_v36  ;;  %v739_v45 = vld [vmem:[%s961_s1 + $0x110] sm:$0xff] }
   0xf   :  { %393 = vmatpush.bf16.msra.mxu1 %v717_v13  ;;  %v524_v44 = vor.u32 %v696_v38, %v521_v39  ;;  %v738_v46 = vld [vmem:[%s961_s1 + $0x108] sm:$0xff]  ;;  %v737_v47 = vld [vmem:[%s961_s1 + $0x100] sm:$0xff]  ;;  %v702_v49 = vld [vmem:[%s962_s0 + $0x38] sm:$0xf0] }
  0x10   :  { %412 = vmatpush.bf16.msra.mxu2 %v725_v14  ;;  %v531_v48 = vld [vmem:[%s962_s0 + $0x28] sm:$0xf]  ;;  %v700_v50 = vld [vmem:[%s962_s0 + $0x2c] sm:$0xf]  ;;  %v533_v51 = vld [vmem:[%s962_s0 + $0x3c] sm:$0xf0] }
  0x11   :  { %431 = vmatpush.bf16.msra.mxu3 %v733_v15  ;;  %v539_v52 = vld [vmem:[%s962_s0 + $0x30] sm:$0xf]  ;;  %v703_v53 = vld [vmem:[%s962_s0 + $0x40] sm:$0xf0]  ;;  %v701_v54 = vld [vmem:[%s962_s0 + $0x34] sm:$0xf]  ;;  %v532_v56 = vor.u32 %v702_v49, %v531_v48  ;;  %v536_v57 = vor.u32 %v700_v50, %v533_v51 }
  0x12   :  { %375 = vmatpush.bf16.msra.mxu0 %v708_v16  ;;  %v541_v55 = vld [vmem:[%s962_s0 + $0x44] sm:$0xf0]  ;;  %v540_v58 = vor.u32 %v703_v53, %v539_v52  ;;  %v527_v60 = vld [vmem:[%s962_s0 + $0x10] sm:$0xf]  ;;  %v699_v61 = vld [vmem:[%s962_s0 + $0x20] sm:$0xf0] }
  0x13   :  { %394 = vmatpush.bf16.msra.mxu1 %v716_v17  ;;  %v544_v59 = vor.u32 %v701_v54, %v541_v55  ;;  %v547_v62 = vld [vmem:[%s962_s0 + $0x38] sm:$0xf]  ;;  %v704_v63 = vld [vmem:[%s962_s0 + $0x48] sm:$0xf0]  ;;  %v528_v0 = vor.u32 %v699_v61, %v527_v60  ;;  %v757_v16 = vmov 0.0  }
  0x14   :  { %413 = vmatpush.bf16.msra.mxu2 %v724_v18  ;;  %v548_v1 = vor.u32 %v704_v63, %v547_v62  ;;  %498 = vst [vmem:[%s963_s3] sm:$0xff] %v757_v16 }
  0x15   :  { %432 = vmatpush.bf16.msra.mxu3 %v732_v19 }
  0x16   :  { %376 = vmatpush.bf16.msra.mxu0 %v707_v20 }
  0x17   :  { %395 = vmatpush.bf16.msra.mxu1 %v715_v21 }
  0x18   :  { %414 = vmatpush.bf16.msra.mxu2 %v723_v22 }
  0x19   :  { %433 = vmatpush.bf16.msra.mxu3 %v731_v23 }
  0x1a   :  { %377 = vmatpush.bf16.msra.mxu0 %v706_v24 }
  0x1b   :  { %396 = vmatpush.bf16.msra.mxu1 %v714_v25 }
  0x1c   :  { %415 = vmatpush.bf16.msra.mxu2 %v722_v26 }
  0x1d   :  { %434 = vmatpush.bf16.msra.mxu3 %v730_v27 }
  0x1e   :  { %378 = vmatpush.bf16.msra.mxu0 %v705_v28 }
  0x1f   :  { %397 = vmatpush.bf16.msra.mxu1 %v713_v29 }
  0x20   :  { %416 = vmatpush.bf16.msra.mxu2 %v721_v30 }
  0x21   :  { %435 = vmatpush.bf16.msra.mxu3 %v729_v31  ;;  %379 = vmatmul.bf16.vlgmr.msra.gmra.mxu0 %v512_v41 }
  0x22   :  { %451 = vmatpush.bf16.msrb.mxu0 %v740_v40  ;;  %398 = vmatmul.bf16.vlgmr.msra.gmra.mxu1 %v516_v42 }
  0x23   :  { %752 = vmatpush.bf16.msrb.mxu1 %v740_v40  ;;  %417 = vmatmul.bf16.vlgmr.msra.gmra.mxu2 %v520_v43 }
  0x24   :  { %436 = vmatmul.bf16.vlgmr.msra.gmra.mxu3 %v524_v44 }
  0x26   :  { %452 = vmatpush.bf16.msrb.mxu0 %v739_v45 }
  0x27   :  { %753 = vmatpush.bf16.msrb.mxu1 %v739_v45 }
  0x2a   :  { %453 = vmatpush.bf16.msrb.mxu0 %v738_v46 }
  0x2b   :  { %754 = vmatpush.bf16.msrb.mxu1 %v738_v46 }
  0x2e   :  { %454 = vmatpush.bf16.msrb.mxu0 %v737_v47 }
  0x2f   :  { %755 = vmatpush.bf16.msrb.mxu1 %v737_v47 }
  0x31   :  { %384 = vmatmul.bf16.gmra.mxu0 %v532_v56 }
  0x32   :  { %403 = vmatmul.bf16.gmra.mxu1 %v536_v57 }
  0x33   :  { %422 = vmatmul.bf16.gmra.mxu2 %v540_v58 }
  0x34   :  { %441 = vmatmul.bf16.gmra.mxu3 %v544_v59 }
  0x41   :  { %693 = vmatmul.msk.bf16.vlgmr.msrb.gmra.mxu0 %vm364_vm0, %v528_v0 }
  0x42   :  { %694 = vmatmul.msk.bf16.vlgmr.msrb.gmra.mxu1 %vm364_vm0, %v548_v1 }
  0x9e   :  { %v380_v2 = vpop.f32.mrf.mxu0 }
  0x9f   :  { %v399_v3 = vpop.f32.mrf.mxu1 }
  0xa0   :  { %v400_v17 = vadd.f32 %v399_v3, %v380_v2 }
  0xa6   :  { %v418_v4 = vpop.f32.mrf.mxu2  ;;  %v382_v6 = vpop.f32.mrf.mxu0 }
  0xa7   :  { %v437_v5 = vpop.f32.mrf.mxu3  ;;  %v401_v7 = vpop.f32.mrf.mxu1  ;;  %v419_v19 = vadd.f32 %v418_v4, %v400_v17 }
  0xa8   :  { %v402_v22 = vadd.f32 %v401_v7, %v382_v6 }
  0xa9   :  { %v438_v28 = vadd.f32 %v437_v5, %v419_v19 }
  0xae   :  { %v420_v8 = vpop.f32.mrf.mxu2  ;;  %v385_v10 = vpop.f32.mrf.mxu0 }
  0xaf   :  { %v439_v9 = vpop.f32.mrf.mxu3  ;;  %v404_v11 = vpop.f32.mrf.mxu1  ;;  %v421_v25 = vadd.f32 %v420_v8, %v402_v22 }
  0xb0   :  { %v405_v23 = vadd.f32 %v404_v11, %v385_v10 }
  0xb1   :  { %v440_v31 = vadd.f32 %v439_v9, %v421_v25 }
  0xb6   :  { %v423_v12 = vpop.f32.mrf.mxu2  ;;  %v387_v13 = vpop.f32.mrf.mxu0 }
  0xb7   :  { %v406_v14 = vpop.f32.mrf.mxu1  ;;  %v442_v15 = vpop.f32.mrf.mxu3  ;;  %v424_v26 = vadd.f32 %v423_v12, %v405_v23 }
  0xb8   :  { %v407_v24 = vadd.f32 %v406_v14, %v387_v13 }
  0xb9   :  { %v443_v32 = vadd.f32 %v442_v15, %v424_v26 }
  0xbe   :  { %v425_v18 = vpop.f32.mrf.mxu2  ;;  %v456_v20 = vpop.f32.mrf.mxu0 }
  0xbf   :  { %v461_v21 = vpop.f32.mrf.mxu1  ;;  %v426_v27 = vadd.f32 %v425_v18, %v407_v24  ;;  %v444_v29 = vpop.f32.mrf.mxu3  ;;  %v457_v30 = vadd.f32 %v456_v20, %v438_v28 }
  0xc0   :  { %v462_v36 = vadd.f32 %v461_v21, %v443_v32 }
  0xc1   :  { %v445_v33 = vadd.f32 %v444_v29, %v426_v27  ;;  %v484_v39 = vmul.f32 %v457_v30, %v457_v30 }
  0xc2   :  { %v486_v44 = vmul.f32 %v462_v36, %v462_v36 }
  0xc6   :  { %v458_v34 = vpop.f32.mrf.mxu0 }
  0xc7   :  { %v463_v35 = vpop.f32.mrf.mxu1  ;;  %v459_v37 = vadd.f32 %v458_v34, %v440_v31 }
  0xc8   :  { %v464_v38 = vadd.f32 %v463_v35, %v445_v33 }
  0xc9   :  { %v744_v40 = vpack.c.bf16 %v459_v37, %v457_v30  ;;  %v474_v41 = vadd.f32 %v459_v37, %v457_v30  ;;  %v485_v42 = vmul.f32 %v459_v37, %v459_v37 }
  0xca   :  { %v749_v43 = vpack.c.bf16 %v464_v38, %v462_v36  ;;  %v487_v48 = vmul.f32 %v464_v38, %v464_v38 }
  0xcb   :  { %745 = vst [vmem:[%s964_s2] sm:$0xff] %v744_v40   ;;  %v488_v45 = vadd.f32 %v485_v42, %v484_v39  ;;  %v475_v46 = vadd.f32 %v474_v41, %v462_v36 }
  0xcc   :  { %751 = vst [vmem:[%s964_s2 + $0x8] sm:$0xff] %v749_v43  }
  0xcd   :  { %v476_v47 = vadd.f32 %v475_v46, %v464_v38  ;;  %v489_v49 = vadd.f32 %v488_v45, %v486_v44 }
  0xcf   :  { %v477_v50 = vrot.slane %v476_v47, 4  ;;  %v490_v51 = vadd.f32 %v489_v49, %v487_v48 }
  0xd1   :  { %v478_v52 = vadd.f32 %v477_v50, %v476_v47  ;;  %v491_v53 = vrot.slane %v490_v51, 4 }
  0xd3   :  { %v479_v54 = vrot.slane %v478_v52, 2  ;;  %v492_v55 = vadd.f32 %v491_v53, %v490_v51 }
  0xd5   :  { %v480_v56 = vadd.f32 %v479_v54, %v478_v52  ;;  %v493_v57 = vrot.slane %v492_v55, 2 }
  0xd7   :  { %v481_v58 = vrot.slane %v480_v56, 1  ;;  %v494_v59 = vadd.f32 %v493_v57, %v492_v55 }
  0xd9   :  { %v482_v60 = vadd.f32 %v481_v58, %v480_v56  ;;  %v495_v61 = vrot.slane %v494_v59, 1 }
  0xdb   :  { %v496_v62 = vadd.f32 %v495_v61, %v494_v59  ;;  %499 = vst [vmem:[%s963_s3] sm:$0x1] %v482_v60 }
  0xdd   :  { %500 = vst [vmem:[%s963_s3 + $0x1] sm:$0x1] %v496_v62 }

// kernel: resnet34_3_forward.18
= control target key start
LH: loop header
LB: loop body
LE: loop exit
PB: predicated region body
PF: predicated region fallthrough
CT: control target
= control target key end

     0   :  { %s149_s0 = inlined_call_operand.vmem [shape: bf16[32,128], index: 0, kind: input, shape index: {}]   ;;  %s150_s1 = inlined_call_operand.vmem [shape: f32[1,128], index: 1, kind: input, shape index: {}]   ;;  %s151_s2 = inlined_call_operand.vmem [shape: f32[1,128], index: 2, kind: input, shape index: {}]   ;;  %s152_s3 = inlined_call_operand.vmem [shape: bf16[32,128], index: 3, kind: input, shape index: {}]   ;;  %s153_s4 = inlined_call_operand.vmem [shape: bf16[32,128], index: 4, kind: output, shape index: {}]  }
   0x1   :  { %v70_v0 = vld [vmem:[%s149_s0] sm:$0xff]   ;;  %v95_v8 = vld [vmem:[%s149_s0 + $0x8] sm:$0xff]  }
   0x2   :  { %v98_v1 = vld [vmem:[%s150_s1] ss:$0 sm:$0xff]  ;;  %v71_v2 = vunpack.c.l.bf16 %v70_v0  ;;  %v72_v3 = vunpack.c.h.bf16 %v70_v0  ;;  %v96_v9 = vld [vmem:[%s152_s3 + $0x8] sm:$0xff]   ;;  %v75_v12 = vunpack.c.l.bf16 %v95_v8  ;;  %v76_v13 = vunpack.c.h.bf16 %v95_v8 }
   0x3   :  { %v99_v4 = vld [vmem:[%s151_s2] ss:$0 sm:$0xff]  ;;  %v83_v14 = vunpack.c.l.bf16 %v96_v9  ;;  %v84_v15 = vunpack.c.h.bf16 %v96_v9 }
   0x4   :  { %v78_v5 = vld [vmem:[%s152_s3] sm:$0xff]   ;;  %v29_v10 = vmul.f32 %v98_v1, %v71_v2  ;;  %v30_v11 = vmul.f32 %v98_v1, %v72_v3  ;;  %v31_v18 = vmul.f32 %v98_v1, %v75_v12  ;;  %v32_v19 = vmul.f32 %v98_v1, %v76_v13 }
   0x5   :  { %v79_v6 = vunpack.c.l.bf16 %v78_v5  ;;  %v80_v7 = vunpack.c.h.bf16 %v78_v5 }
   0x6   :  { %v37_v16 = vadd.f32 %v99_v4, %v29_v10  ;;  %v38_v17 = vadd.f32 %v99_v4, %v30_v11  ;;  %v39_v22 = vadd.f32 %v99_v4, %v31_v18  ;;  %v40_v23 = vadd.f32 %v99_v4, %v32_v19 }
   0x8   :  { %v49_v20 = vadd.f32 %v79_v6, %v37_v16  ;;  %v50_v21 = vadd.f32 %v80_v7, %v38_v17  ;;  %v51_v26 = vadd.f32 %v83_v14, %v39_v22  ;;  %v52_v27 = vadd.f32 %v84_v15, %v40_v23 }
   0xa   :  { %v53_v24 = vmax.f32 %v49_v20, 0.0  ;;  %v54_v25 = vmax.f32 %v50_v21, 0.0  ;;  %v55_v29 = vmax.f32 %v51_v26, 0.0  ;;  %v56_v30 = vmax.f32 %v52_v27, 0.0 }
   0xc   :  { %v88_v28 = vpack.c.bf16 %v54_v25, %v53_v24  ;;  %v93_v31 = vpack.c.bf16 %v56_v30, %v55_v29 }
   0xe   :  { %89 = vst [vmem:[%s153_s4] sm:$0xff] %v88_v28  }
   0xf   :  { %97 = vst [vmem:[%s153_s4 + $0x8] sm:$0xff] %v93_v31  }

// kernel: resnet34_3_forward.17
= control target key start
LH: loop header
LB: loop body
LE: loop exit
PB: predicated region body
PF: predicated region fallthrough
CT: control target
= control target key end

     0   :  { %s2145_s1 = inlined_call_operand.vmem [shape: bf16[1152,128], index: 1, kind: input, shape index: {}]   ;;  %s2146_s0 = inlined_call_operand.vmem [shape: bf16[32,1152], index: 0, kind: input, shape index: {}]   ;;  %s2147_s2 = inlined_call_operand.vmem [shape: f32[1,1152], index: 2, kind: input, shape index: {}]   ;;  %s2148_s3 = inlined_call_operand.vmem [shape: f32[1,1152], index: 3, kind: input, shape index: {}]   ;;  %s2149_s5 = inlined_call_operand.vmem [shape: f32[1,8,128], index: 5, kind: output, shape index: {1}]   ;;  %s2150_s4 = inlined_call_operand.vmem [shape: bf16[32,128], index: 4, kind: output, shape index: {0}]  }
   0x1   :  { %v1554_v0 = vld [vmem:[%s2145_s1 + $0x38] sm:$0xff]  ;;  %v1553_v4 = vld [vmem:[%s2145_s1 + $0x30] sm:$0xff]  ;;  %v1552_v8 = vld [vmem:[%s2145_s1 + $0x28] sm:$0xff] }
   0x2   :  { %v1562_v1 = vld [vmem:[%s2145_s1 + $0x78] sm:$0xff]  ;;  %955 = vmatpush.bf16.msra.mxu0 %v1554_v0  ;;  %v1561_v5 = vld [vmem:[%s2145_s1 + $0x70] sm:$0xff]  ;;  %v1560_v9 = vld [vmem:[%s2145_s1 + $0x68] sm:$0xff] }
   0x3   :  { %v1570_v2 = vld [vmem:[%s2145_s1 + $0xb8] sm:$0xff]  ;;  %974 = vmatpush.bf16.msra.mxu1 %v1562_v1  ;;  %v1569_v6 = vld [vmem:[%s2145_s1 + $0xb0] sm:$0xff]  ;;  %v1568_v10 = vld [vmem:[%s2145_s1 + $0xa8] sm:$0xff] }
   0x4   :  { %v1578_v3 = vld [vmem:[%s2145_s1 + $0xf8] sm:$0xff]  ;;  %993 = vmatpush.bf16.msra.mxu2 %v1570_v2  ;;  %v1577_v7 = vld [vmem:[%s2145_s1 + $0xf0] sm:$0xff]  ;;  %v1576_v11 = vld [vmem:[%s2145_s1 + $0xe8] sm:$0xff] }
   0x5   :  { %1012 = vmatpush.bf16.msra.mxu3 %v1578_v3  ;;  %v1551_v12 = vld [vmem:[%s2145_s1 + $0x20] sm:$0xff]  ;;  %v20_v26 = vld [vmem:[%s2146_s0 + $0x8] sm:$0xff]  ;;  %v1550_v32 = vld [vmem:[%s2145_s1 + $0x18] sm:$0xff] }
   0x6   :  { %956 = vmatpush.bf16.msra.mxu0 %v1553_v4  ;;  %v1559_v13 = vld [vmem:[%s2145_s1 + $0x60] sm:$0xff]  ;;  %v25_v27 = vld [vmem:[%s2146_s0 + $0x2c] sm:$0xff]  ;;  %v41_v30 = vunpack.c.l.bf16 %v20_v26  ;;  %v42_v31 = vunpack.c.h.bf16 %v20_v26  ;;  %v1558_v33 = vld [vmem:[%s2145_s1 + $0x58] sm:$0xff] }
   0x7   :  { %975 = vmatpush.bf16.msra.mxu1 %v1561_v5  ;;  %v1567_v14 = vld [vmem:[%s2145_s1 + $0xa0] sm:$0xff]  ;;  %v50_v37 = vunpack.c.l.bf16 %v25_v27  ;;  %v1566_v38 = vld [vmem:[%s2145_s1 + $0x98] sm:$0xff]  ;;  %v51_v41 = vunpack.c.h.bf16 %v25_v27  ;;  %v1549_v48 = vld [vmem:[%s2145_s1 + $0x10] sm:$0xff] }
   0x8   :  { %994 = vmatpush.bf16.msra.mxu2 %v1569_v6  ;;  %v1575_v15 = vld [vmem:[%s2145_s1 + $0xe0] sm:$0xff]  ;;  %v1574_v39 = vld [vmem:[%s2145_s1 + $0xd8] sm:$0xff]  ;;  %v1557_v53 = vld [vmem:[%s2145_s1 + $0x50] sm:$0xff] }
   0x9   :  { %1013 = vmatpush.bf16.msra.mxu3 %v1577_v7  ;;  %v19_v16 = vld [vmem:[%s2146_s0] sm:$0xff]  ;;  %v29_v58 = vld [vmem:[%s2146_s0 + $0x48] sm:$0xff]  ;;  %v1565_v60 = vld [vmem:[%s2145_s1 + $0x90] sm:$0xff] }
   0xa   :  { %957 = vmatpush.bf16.msra.mxu0 %v1552_v8  ;;  %v24_v17 = vld [vmem:[%s2146_s0 + $0x24] sm:$0xff]  ;;  %v39_v18 = vunpack.c.l.bf16 %v19_v16  ;;  %v40_v19 = vunpack.c.h.bf16 %v19_v16  ;;  %v34_v59 = vld [vmem:[%s2146_s0 + $0x6c] sm:$0xff]  ;;  %v57_v3 = vunpack.c.l.bf16 %v29_v58  ;;  %v58_v4 = vunpack.c.h.bf16 %v29_v58 }
   0xb   :  { %976 = vmatpush.bf16.msra.mxu1 %v1560_v9  ;;  %v1729_v20 = vld [vmem:[%s2147_s2] sm:$0xff]  ;;  %v48_v22 = vunpack.c.l.bf16 %v24_v17  ;;  %v49_v23 = vunpack.c.h.bf16 %v24_v17  ;;  %v1573_v61 = vld [vmem:[%s2145_s1 + $0xd0] sm:$0xff]  ;;  %v66_v5 = vunpack.c.l.bf16 %v34_v59 }
   0xc   :  { %995 = vmatpush.bf16.msra.mxu2 %v1568_v10  ;;  %v1734_v21 = vld [vmem:[%s2148_s3] sm:$0xff]  ;;  %v1737_v24 = vperm.slane %v1729_v20, 0  ;;  %v1740_v25 = vperm.slane %v1729_v20, 1  ;;  %v1771_v42 = vperm.slane %v1729_v20, 2  ;;  %v1774_v43 = vperm.slane %v1729_v20, 3  ;;  %v30_v6 = vld [vmem:[%s2146_s0 + $0x50] sm:$0xff] }
   0xd   :  { %1014 = vmatpush.bf16.msra.mxu3 %v1576_v11  ;;  %v1749_v28 = vperm.slane %v1734_v21, 0  ;;  %v1752_v29 = vperm.slane %v1734_v21, 1  ;;  %v1780_v47 = vperm.slane %v1734_v21, 2  ;;  %v1806_v63 = vperm.slane %v1734_v21, 3  ;;  %v1548_v11 = vld [vmem:[%s2145_s1 + $0x8] sm:$0xff]  ;;  %v35_v17 = vld [vmem:[%s2146_s0 + $0x74] sm:$0xff] }
   0xe   :  { %958 = vmatpush.bf16.msra.mxu0 %v1551_v12  ;;  %v97_v34 = vmul.f32 %v1737_v24, %v39_v18  ;;  %v98_v35 = vmul.f32 %v1740_v25, %v40_v19  ;;  %v106_v36 = vmul.f32 %v1737_v24, %v48_v22  ;;  %v107_v40 = vmul.f32 %v1740_v25, %v49_v23  ;;  %v1556_v12 = vld [vmem:[%s2145_s1 + $0x48] sm:$0xff] }
   0xf   :  { %977 = vmatpush.bf16.msra.mxu1 %v1559_v13  ;;  %v99_v50 = vmul.f32 %v1771_v42, %v41_v30  ;;  %v100_v51 = vmul.f32 %v1774_v43, %v42_v31  ;;  %v108_v52 = vmul.f32 %v1771_v42, %v50_v37  ;;  %v109_v57 = vmul.f32 %v1774_v43, %v51_v41  ;;  %v1564_v18 = vld [vmem:[%s2145_s1 + $0x88] sm:$0xff] }
  0x10   :  { %996 = vmatpush.bf16.msra.mxu2 %v1567_v14  ;;  %v155_v44 = vadd.f32 %v1749_v28, %v97_v34  ;;  %v156_v45 = vadd.f32 %v1752_v29, %v98_v35  ;;  %v164_v46 = vadd.f32 %v1749_v28, %v106_v36  ;;  %v165_v49 = vadd.f32 %v1752_v29, %v107_v40  ;;  %v1572_v19 = vld [vmem:[%s2145_s1 + $0xc8] sm:$0xff]  ;;  %v1839_v34 = vld [vmem:[%s2146_s0 + $0x10] sm:$0xff] }
  0x11   :  { %1015 = vmatpush.bf16.msra.mxu3 %v1575_v15  ;;  %v157_v0 = vadd.f32 %v1780_v47, %v99_v50  ;;  %v166_v1 = vadd.f32 %v1780_v47, %v108_v52  ;;  %v158_v8 = vadd.f32 %v1806_v63, %v100_v51  ;;  %v167_v9 = vadd.f32 %v1806_v63, %v109_v57  ;;  %v1586_v51 = vld [vmem:[%s2145_s1 + $0x138] sm:$0xff] }
  0x12   :  { %959 = vmatpush.bf16.msra.mxu0 %v1550_v32  ;;  %v191_v54 = vmax.f32 %v155_v44, 0.0  ;;  %v192_v55 = vmax.f32 %v156_v45, 0.0  ;;  %v200_v56 = vmax.f32 %v164_v46, 0.0  ;;  %v201_v62 = vmax.f32 %v165_v49, 0.0  ;;  %v1563_v45 = vld [vmem:[%s2145_s1 + $0x80] sm:$0xff]  ;;  %v1594_v52 = vld [vmem:[%s2145_s1 + $0x178] sm:$0xff] }
  0x13   :  { %978 = vmatpush.bf16.msra.mxu1 %v1558_v33  ;;  %v193_v10 = vmax.f32 %v157_v0, 0.0  ;;  %v202_v13 = vmax.f32 %v166_v1, 0.0  ;;  %v67_v14 = vunpack.c.h.bf16 %v34_v59  ;;  %v115_v15 = vmul.f32 %v1737_v24, %v57_v3  ;;  %v1571_v46 = vld [vmem:[%s2145_s1 + $0xc0] sm:$0xff]  ;;  %v1602_v59 = vld [vmem:[%s2145_s1 + $0x1b8] sm:$0xff] }
  0x14   :  { %997 = vmatpush.bf16.msra.mxu2 %v1566_v38  ;;  %v227_v2 = vpack.c.bf16 %v192_v55, %v191_v54  ;;  %v232_v7 = vpack.c.bf16 %v201_v62, %v200_v56  ;;  %v116_v16 = vmul.f32 %v1740_v25, %v58_v4  ;;  %v194_v22 = vmax.f32 %v158_v8, 0.0 }
  0x15   :  { %1016 = vmatpush.bf16.msra.mxu3 %v1574_v39  ;;  %v203_v23 = vmax.f32 %v167_v9, 0.0  ;;  %v124_v26 = vmul.f32 %v1737_v24, %v66_v5  ;;  %v59_v27 = vunpack.c.l.bf16 %v30_v6  ;;  %v125_v30 = vmul.f32 %v1740_v25, %v67_v14  ;;  %v1547_v24 = vld [vmem:[%s2145_s1] sm:$0xff] }
  0x16   :  { %960 = vmatpush.bf16.msra.mxu0 %v1549_v48  ;;  %247 = vst [vmem:[#allocation2] sm:$0xff] %v227_v2  ;;  %v173_v31 = vadd.f32 %v1749_v28, %v115_v15  ;;  %v174_v32 = vadd.f32 %v1752_v29, %v116_v16  ;;  %v60_v33 = vunpack.c.h.bf16 %v30_v6  ;;  %v228_v35 = vpack.c.bf16 %v194_v22, %v193_v10  ;;  %v1555_v25 = vld [vmem:[%s2145_s1 + $0x40] sm:$0xff]  ;;  %v1889_v10 = vld [vmem:[%s2146_s0 + $0x18] sm:$0xff] }
  0x17   :  { %979 = vmatpush.bf16.msra.mxu1 %v1557_v53  ;;  %252 = vst [vmem:[#allocation2 + $0x24] sm:$0xff] %v232_v7  ;;  %v233_v36 = vpack.c.bf16 %v203_v23, %v202_v13  ;;  %v182_v37 = vadd.f32 %v1749_v28, %v124_v26  ;;  %v68_v38 = vunpack.c.l.bf16 %v35_v17  ;;  %v183_v39 = vadd.f32 %v1752_v29, %v125_v30  ;;  %v1852_v28 = vld [vmem:[%s2146_s0 + $0x34] sm:$0xff]  ;;  %v1901_v14 = vld [vmem:[%s2146_s0 + $0x3c] sm:$0xff] }
  0x18   :  { %998 = vmatpush.bf16.msra.mxu2 %v1565_v60  ;;  %v209_v40 = vmax.f32 %v173_v31, 0.0  ;;  %v210_v41 = vmax.f32 %v174_v32, 0.0  ;;  %v69_v44 = vunpack.c.h.bf16 %v35_v17  ;;  %248 = vst [vmem:[#allocation2 + $0x8] sm:$0xff] %v228_v35  ;;  %v117_v48 = vmul.f32 %v1771_v42, %v59_v27  ;;  %v1585_v7 = vld [vmem:[%s2145_s1 + $0x130] sm:$0xff] }
  0x19   :  { %1017 = vmatpush.bf16.msra.mxu3 %v1573_v61  ;;  %v218_v29 = vmax.f32 %v182_v37, 0.0  ;;  %v118_v49 = vmul.f32 %v1774_v43, %v60_v33  ;;  %v43_v50 = vunpack.c.l.bf16 %v1839_v34  ;;  %253 = vst [vmem:[#allocation2 + $0x2c] sm:$0xff] %v233_v36  ;;  %v219_v53 = vmax.f32 %v183_v39, 0.0  ;;  %v1601_v23 = vld [vmem:[%s2145_s1 + $0x1b0] sm:$0xff]  ;;  %v1584_v39 = vld [vmem:[%s2145_s1 + $0x128] sm:$0xff] }
  0x1a   :  { %961 = vmatpush.bf16.msra.mxu0 %v1548_v11  ;;  %v237_v54 = vpack.c.bf16 %v210_v41, %v209_v40  ;;  %v126_v55 = vmul.f32 %v1771_v42, %v68_v38  ;;  %v127_v56 = vmul.f32 %v1774_v43, %v69_v44  ;;  %v175_v60 = vadd.f32 %v1780_v47, %v117_v48  ;;  %v1610_v43 = vld [vmem:[%s2145_s1 + $0x1f8] sm:$0xff]  ;;  %v1592_v40 = vld [vmem:[%s2145_s1 + $0x168] sm:$0xff] }
  0x1b   :  { %980 = vmatpush.bf16.msra.mxu1 %v1556_v12  ;;  %v176_v61 = vadd.f32 %v1806_v63, %v118_v49  ;;  %v44_v62 = vunpack.c.h.bf16 %v1839_v34  ;;  %v52_v0 = vunpack.c.l.bf16 %v1852_v28  ;;  %v242_v2 = vpack.c.bf16 %v219_v53, %v218_v29  ;;  %v1609_v34 = vld [vmem:[%s2145_s1 + $0x1f0] sm:$0xff]  ;;  %v1935_v44 = vld [vmem:[%s2146_s0 + $0x58] sm:$0xff] }
  0x1c   :  { %999 = vmatpush.bf16.msra.mxu2 %v1564_v18  ;;  %257 = vst [vmem:[#allocation2 + $0x48] sm:$0xff] %v237_v54  ;;  %v184_v3 = vadd.f32 %v1780_v47, %v126_v55  ;;  %v185_v4 = vadd.f32 %v1806_v63, %v127_v56  ;;  %v211_v8 = vmax.f32 %v175_v60, 0.0  ;;  %v1593_v47 = vld [vmem:[%s2145_s1 + $0x170] sm:$0xff]  ;;  %v53_v12 = vunpack.c.h.bf16 %v1852_v28  ;;  %v1600_v28 = vld [vmem:[%s2145_s1 + $0x1a8] sm:$0xff]  ;;  %v36_v56 = vld [vmem:[%s2146_s0 + $0x7c] sm:$0xff] }
  0x1d   :  { %1018 = vmatpush.bf16.msra.mxu3 %v1572_v19  ;;  %v1171_v57 = vld [vmem:[#allocation2] sm:$0xf]  ;;  %v1529_v58 = vld [vmem:[#allocation2 + $0x4] sm:$0xf]  ;;  %v212_v9 = vmax.f32 %v176_v61, 0.0  ;;  %262 = vst [vmem:[#allocation2 + $0x6c] sm:$0xff] %v242_v2  ;;  %v45_v31 = vunpack.c.l.bf16 %v1889_v10  ;;  %v46_v37 = vunpack.c.h.bf16 %v1889_v10  ;;  %v54_v38 = vunpack.c.l.bf16 %v1901_v14 }
  0x1e   :  { %962 = vmatpush.bf16.msra.mxu0 %v1547_v24  ;;  %v1533_v1 = vld [vmem:[#allocation2 + $0x20] sm:$0xf0]  ;;  %v1173_v42 = vld [vmem:[#allocation2 + $0x24] sm:$0xf0]  ;;  %v220_v63 = vmax.f32 %v184_v3, 0.0  ;;  %v221_v11 = vmax.f32 %v185_v4, 0.0  ;;  %v61_v61 = vunpack.c.l.bf16 %v1935_v44 }
  0x1f   :  { %981 = vmatpush.bf16.msra.mxu1 %v1555_v25  ;;  %v1172_v5 = vor.u32 %v1533_v1, %v1171_v57  ;;  %v1176_v6 = vor.u32 %v1529_v58, %v1173_v42  ;;  %v1896_v13 = vperm.slane %v1729_v20, 4  ;;  %v238_v15 = vpack.c.bf16 %v212_v9, %v211_v8  ;;  %v1179_v19 = vld [vmem:[#allocation2 + $0x8] sm:$0xf]  ;;  %v1530_v22 = vld [vmem:[#allocation2 + $0xc] sm:$0xf]  ;;  %v1983_v3 = vld [vmem:[%s2146_s0 + $0x60] sm:$0xff] }
  0x20   :  { %1000 = vmatpush.bf16.msra.mxu2 %v1563_v45  ;;  %v1904_v16 = vperm.slane %v1729_v20, 5  ;;  %v1907_v17 = vperm.slane %v1734_v21, 4  ;;  %v1910_v18 = vperm.slane %v1734_v21, 5  ;;  %v243_v26 = vpack.c.bf16 %v221_v11, %v220_v63  ;;  %v1534_v32 = vld [vmem:[#allocation2 + $0x28] sm:$0xf0]  ;;  %v1599_v8 = vld [vmem:[%s2145_s1 + $0x1a0] sm:$0xff] }
  0x21   :  { %1019 = vmatpush.bf16.msra.mxu3 %v1571_v46  ;;  %963 = vmatmul.bf16.vlgmr.msra.gmra.mxu0 %v1172_v5  ;;  %v101_v27 = vmul.f32 %v1896_v13, %v43_v50  ;;  %v110_v30 = vmul.f32 %v1896_v13, %v52_v0  ;;  %v1181_v33 = vld [vmem:[#allocation2 + $0x2c] sm:$0xf0]  ;;  %258 = vst [vmem:[#allocation2 + $0x50] sm:$0xff] %v238_v15  ;;  %v55_v50 = vunpack.c.h.bf16 %v1901_v14  ;;  %v1952_v53 = vperm.slane %v1729_v20, 6  ;;  %v1591_v0 = vld [vmem:[%s2145_s1 + $0x160] sm:$0xff] }
  0x22   :  { %1031 = vmatpush.bf16.msrb.mxu0 %v1586_v51  ;;  %982 = vmatmul.bf16.vlgmr.msra.gmra.mxu1 %v1176_v6  ;;  %v102_v35 = vmul.f32 %v1904_v16, %v44_v62  ;;  %v111_v36 = vmul.f32 %v1904_v16, %v53_v12  ;;  %v1180_v24 = vor.u32 %v1534_v32, %v1179_v19  ;;  %v1608_v51 = vld [vmem:[%s2145_s1 + $0x1e8] sm:$0xff]  ;;  %v1955_v54 = vperm.slane %v1729_v20, 7  ;;  %v1583_v62 = vld [vmem:[%s2145_s1 + $0x120] sm:$0xff] }
  0x23   :  { %1050 = vmatpush.bf16.msrb.mxu1 %v1594_v52  ;;  %v1184_v25 = vor.u32 %v1530_v22, %v1181_v33  ;;  %263 = vst [vmem:[#allocation2 + $0x74] sm:$0xff] %v243_v26  ;;  %v159_v41 = vadd.f32 %v1907_v17, %v101_v27  ;;  %v1940_v45 = vld [vmem:[#allocation2 + $0x48] sm:$0xf]  ;;  %v1942_v46 = vld [vmem:[#allocation2 + $0x4c] sm:$0xf]  ;;  %v168_v48 = vadd.f32 %v1907_v17, %v110_v30  ;;  %v1958_v55 = vperm.slane %v1734_v21, 6 }
  0x24   :  { %1069 = vmatpush.bf16.msrb.mxu2 %v1602_v59  ;;  %v160_v29 = vadd.f32 %v1910_v18, %v102_v35  ;;  %v169_v49 = vadd.f32 %v1910_v18, %v111_v36  ;;  %v1963_v57 = vld [vmem:[#allocation2 + $0x68] sm:$0xf0]  ;;  %v1965_v58 = vld [vmem:[#allocation2 + $0x6c] sm:$0xf0]  ;;  %v62_v20 = vunpack.c.h.bf16 %v1935_v44  ;;  %v103_v2 = vmul.f32 %v1952_v53, %v45_v31  ;;  %v1607_v14 = vld [vmem:[%s2145_s1 + $0x1e0] sm:$0xff] }
  0x25   :  { %1088 = vmatpush.bf16.msrb.mxu3 %v1610_v43  ;;  %1001 = vmatmul.bf16.vlgmr.msra.gmra.mxu2 %v1180_v24  ;;  %v195_v52 = vmax.f32 %v159_v41, 0.0  ;;  %v204_v60 = vmax.f32 %v168_v48, 0.0  ;;  %v1208_v1 = vor.u32 %v1963_v57, %v1940_v45  ;;  %v1212_v42 = vor.u32 %v1942_v46, %v1965_v58  ;;  %v1582_v30 = vld [vmem:[%s2145_s1 + $0x118] sm:$0xff] }
  0x26   :  { %1032 = vmatpush.bf16.msrb.mxu0 %v1585_v7  ;;  %1020 = vmatmul.bf16.vlgmr.msra.gmra.mxu3 %v1184_v25  ;;  %v196_v59 = vmax.f32 %v160_v29, 0.0  ;;  %v205_v43 = vmax.f32 %v169_v49, 0.0  ;;  %v104_v5 = vmul.f32 %v1955_v54, %v46_v37  ;;  %v112_v6 = vmul.f32 %v1952_v53, %v54_v38  ;;  %v1590_v31 = vld [vmem:[%s2145_s1 + $0x158] sm:$0xff]  ;;  %v1589_v29 = vld [vmem:[%s2145_s1 + $0x150] sm:$0xff] }
  0x27   :  { %1051 = vmatpush.bf16.msrb.mxu1 %v1593_v47  ;;  %v113_v7 = vmul.f32 %v1955_v54, %v55_v50  ;;  %v1996_v63 = vperm.slane %v1734_v21, 7  ;;  %v161_v11 = vadd.f32 %v1958_v55, %v103_v2  ;;  %v70_v12 = vunpack.c.l.bf16 %v36_v56  ;;  %v1598_v41 = vld [vmem:[%s2145_s1 + $0x198] sm:$0xff] }
  0x28   :  { %1070 = vmatpush.bf16.msrb.mxu2 %v1601_v23  ;;  %v229_v4 = vpack.c.bf16 %v196_v59, %v195_v52  ;;  %v1991_v9 = vld [vmem:[#allocation2 + $0x50] sm:$0xf]  ;;  %v1993_v10 = vld [vmem:[#allocation2 + $0x54] sm:$0xf]  ;;  %v234_v47 = vpack.c.bf16 %v205_v43, %v204_v60  ;;  %v170_v22 = vadd.f32 %v1958_v55, %v112_v6  ;;  %v71_v23 = vunpack.c.h.bf16 %v36_v56  ;;  %v1606_v44 = vld [vmem:[%s2145_s1 + $0x1d8] sm:$0xff] }
  0x29   :  { %1089 = vmatpush.bf16.msrb.mxu3 %v1609_v34  ;;  %v119_v21 = vmul.f32 %v1896_v13, %v61_v61  ;;  %v63_v26 = vunpack.c.l.bf16 %v1983_v3  ;;  %v162_v33 = vadd.f32 %v1996_v63, %v104_v5  ;;  %v37_v34 = vld [vmem:[%s2146_s0 + $0x84] sm:$0xff]  ;;  %v171_v35 = vadd.f32 %v1996_v63, %v113_v7  ;;  %v23_v59 = vld [vmem:[%s2146_s0 + $0x20] sm:$0xf] }
  0x2a   :  { %1033 = vmatpush.bf16.msrb.mxu0 %v1584_v39  ;;  %v2002_v15 = vld [vmem:[#allocation2 + $0x70] sm:$0xf0]  ;;  %v2004_v19 = vld [vmem:[#allocation2 + $0x74] sm:$0xf0]  ;;  %249 = vst [vmem:[#allocation2 + $0x10] sm:$0xff] %v229_v4  ;;  %v197_v36 = vmax.f32 %v161_v11, 0.0  ;;  %v120_v38 = vmul.f32 %v1904_v16, %v62_v20  ;;  %v128_v25 = vmul.f32 %v1896_v13, %v70_v12  ;;  %v129_v39 = vmul.f32 %v1904_v16, %v71_v23 }
  0x2b   :  { %1052 = vmatpush.bf16.msrb.mxu1 %v1592_v40  ;;  %v1216_v27 = vor.u32 %v2002_v15, %v1991_v9  ;;  %v1220_v32 = vor.u32 %v1993_v10, %v2004_v19  ;;  %254 = vst [vmem:[#allocation2 + $0x34] sm:$0xff] %v234_v47  ;;  %v206_v37 = vmax.f32 %v170_v22, 0.0  ;;  %v198_v24 = vmax.f32 %v162_v33, 0.0  ;;  %v1581_v16 = vld [vmem:[%s2145_s1 + $0x110] sm:$0xff]  ;;  %v28_v60 = vld [vmem:[%s2146_s0 + $0x44] sm:$0xf] }
  0x2c   :  { %1071 = vmatpush.bf16.msrb.mxu2 %v1600_v28  ;;  %v177_v40 = vadd.f32 %v1907_v17, %v119_v21  ;;  %v207_v28 = vmax.f32 %v171_v35, 0.0  ;;  %v178_v45 = vadd.f32 %v1910_v18, %v120_v38  ;;  %v64_v46 = vunpack.c.h.bf16 %v1983_v3  ;;  %v1639_v5 = vld [vmem:[%s2147_s2 + $0x8] ss:$0 sm:$0xff]  ;;  %v38_v12 = vld [vmem:[%s2146_s0 + $0x8c] sm:$0xf]  ;;  %v1579_v19 = vld [vmem:[%s2145_s1 + $0x100] sm:$0xff] }
  0x2d   :  { %1090 = vmatpush.bf16.msrb.mxu3 %v1608_v51  ;;  %v72_v13 = vunpack.c.l.bf16 %v37_v34  ;;  %v230_v48 = vpack.c.bf16 %v198_v24, %v197_v36  ;;  %v186_v49 = vadd.f32 %v1907_v17, %v128_v25  ;;  %v187_v50 = vadd.f32 %v1910_v18, %v129_v39  ;;  %v1597_v17 = vld [vmem:[%s2145_s1 + $0x190] sm:$0xff]  ;;  %v1640_v6 = vld [vmem:[%s2148_s3 + $0x8] ss:$0 sm:$0xff]  ;;  %v1618_v35 = vld [vmem:[%s2145_s1 + $0x238] sm:$0xff] }
  0x2e   :  { %1034 = vmatpush.bf16.msrb.mxu0 %v1583_v62  ;;  %v213_v51 = vmax.f32 %v177_v40, 0.0  ;;  %v235_v52 = vpack.c.bf16 %v207_v28, %v206_v37  ;;  %v214_v56 = vmax.f32 %v178_v45, 0.0  ;;  %v73_v57 = vunpack.c.h.bf16 %v37_v34  ;;  %v33_v7 = vld [vmem:[%s2146_s0 + $0x68] sm:$0xf]  ;;  %v1603_v28 = vld [vmem:[%s2145_s1 + $0x1c0] sm:$0xff] }
  0x2f   :  { %1053 = vmatpush.bf16.msrb.mxu1 %v1591_v0  ;;  %v121_v58 = vmul.f32 %v1952_v53, %v63_v26  ;;  %250 = vst [vmem:[#allocation2 + $0x18] sm:$0xff] %v230_v48  ;;  %v222_v18 = vmax.f32 %v186_v49, 0.0  ;;  %v122_v61 = vmul.f32 %v1955_v54, %v64_v46  ;;  %v130_v20 = vmul.f32 %v1952_v53, %v72_v13  ;;  %v1605_v0 = vld [vmem:[%s2145_s1 + $0x1d0] sm:$0xff] }
  0x30   :  { %1072 = vmatpush.bf16.msrb.mxu2 %v1599_v8  ;;  %v47_v62 = vunpack.c.l.bf16 %v23_v59  ;;  %255 = vst [vmem:[#allocation2 + $0x3c] sm:$0xff] %v235_v52  ;;  %v223_v43 = vmax.f32 %v187_v50, 0.0  ;;  %v239_v2 = vpack.c.bf16 %v214_v56, %v213_v51  ;;  %v131_v53 = vmul.f32 %v1955_v54, %v73_v57  ;;  %v1617_v49 = vld [vmem:[%s2145_s1 + $0x230] sm:$0xff] }
  0x31   :  { %1091 = vmatpush.bf16.msrb.mxu3 %v1607_v14  ;;  %968 = vmatmul.bf16.gmra.mxu0 %v1208_v1  ;;  %v1580_v1 = vld [vmem:[%s2145_s1 + $0x108] sm:$0xff]  ;;  %v56_v3 = vunpack.c.l.bf16 %v28_v60  ;;  %v179_v4 = vadd.f32 %v1958_v55, %v121_v58  ;;  %v180_v54 = vadd.f32 %v1996_v63, %v122_v61  ;;  %v188_v47 = vadd.f32 %v1958_v55, %v130_v20  ;;  %v1187_v33 = vld [vmem:[#allocation2 + $0x10] sm:$0xf]  ;;  %v1531_v34 = vld [vmem:[#allocation2 + $0x14] sm:$0xf] }
  0x32   :  { %1035 = vmatpush.bf16.msrb.mxu0 %v1582_v30  ;;  %987 = vmatmul.bf16.gmra.mxu1 %v1212_v42  ;;  %v1588_v42 = vld [vmem:[%s2145_s1 + $0x148] sm:$0xff]  ;;  %v244_v8 = vpack.c.bf16 %v223_v43, %v222_v18  ;;  %259 = vst [vmem:[#allocation2 + $0x58] sm:$0xff] %v239_v2  ;;  %v189_v11 = vadd.f32 %v1996_v63, %v131_v53  ;;  %v65_v21 = vunpack.c.l.bf16 %v33_v7  ;;  %v74_v10 = vunpack.c.l.bf16 %v38_v12  ;;  %v1535_v24 = vld [vmem:[#allocation2 + $0x30] sm:$0xf0]  ;;  %v1189_v25 = vld [vmem:[#allocation2 + $0x34] sm:$0xf0] }
  0x33   :  { %1054 = vmatpush.bf16.msrb.mxu1 %v1590_v31  ;;  %v215_v14 = vmax.f32 %v179_v4, 0.0  ;;  %v105_v22 = vmul.f32 %v1639_v5, %v47_v62  ;;  %v114_v23 = vmul.f32 %v1639_v5, %v56_v3  ;;  %v1596_v55 = vld [vmem:[%s2145_s1 + $0x188] sm:$0xff]  ;;  %v216_v9 = vmax.f32 %v180_v54, 0.0  ;;  %v1615_v61 = vld [vmem:[%s2145_s1 + $0x220] sm:$0xff]  ;;  %v1613_v3 = vld [vmem:[%s2145_s1 + $0x210] sm:$0xff] }
  0x34   :  { %1073 = vmatpush.bf16.msrb.mxu2 %v1598_v41  ;;  %v1604_v63 = vld [vmem:[%s2145_s1 + $0x1c8] sm:$0xff]  ;;  %264 = vst [vmem:[#allocation2 + $0x7c] sm:$0xff] %v244_v8  ;;  %v224_v15 = vmax.f32 %v188_v47, 0.0  ;;  %v225_v26 = vmax.f32 %v189_v11, 0.0  ;;  %v132_v38 = vmul.f32 %v1639_v5, %v74_v10  ;;  %v1192_v48 = vor.u32 %v1531_v34, %v1189_v25  ;;  %v1611_v47 = vld [vmem:[%s2145_s1 + $0x200] sm:$0xff] }
  0x35   :  { %1092 = vmatpush.bf16.msrb.mxu3 %v1606_v44  ;;  %1006 = vmatmul.bf16.gmra.mxu2 %v1216_v27  ;;  %v1587_v27 = vld [vmem:[%s2145_s1 + $0x140] sm:$0xff]  ;;  %v163_v30 = vadd.f32 %v1640_v6, %v105_v22  ;;  %v172_v31 = vadd.f32 %v1640_v6, %v114_v23  ;;  %v240_v36 = vpack.c.bf16 %v216_v9, %v215_v14  ;;  %v1616_v18 = vld [vmem:[%s2145_s1 + $0x228] sm:$0xff] }
  0x36   :  { %1036 = vmatpush.bf16.msrb.mxu0 %v1581_v16  ;;  %1025 = vmatmul.bf16.gmra.mxu3 %v1220_v32  ;;  %v123_v32 = vmul.f32 %v1639_v5, %v65_v21  ;;  %v245_v37 = vpack.c.bf16 %v225_v26, %v224_v15  ;;  %v1595_v44 = vld [vmem:[%s2145_s1 + $0x180] sm:$0xff]  ;;  %v190_v45 = vadd.f32 %v1640_v6, %v132_v38  ;;  %v1195_v51 = vld [vmem:[#allocation2 + $0x18] sm:$0xf]  ;;  %v1532_v52 = vld [vmem:[#allocation2 + $0x1c] sm:$0xf] }
  0x37   :  { %1055 = vmatpush.bf16.msrb.mxu1 %v1589_v29  ;;  %v199_v39 = vmax.f32 %v163_v30, 0.0  ;;  %v208_v40 = vmax.f32 %v172_v31, 0.0  ;;  %260 = vst [vmem:[#allocation2 + $0x60] sm:$0xff] %v240_v36  ;;  %v1188_v29 = vor.u32 %v1535_v24, %v1187_v33  ;;  %v1536_v57 = vld [vmem:[#allocation2 + $0x38] sm:$0xf0]  ;;  %v1612_v54 = vld [vmem:[%s2145_s1 + $0x208] sm:$0xff] }
  0x38   :  { %1074 = vmatpush.bf16.msrb.mxu2 %v1597_v17  ;;  %v181_v41 = vadd.f32 %v1640_v6, %v123_v32  ;;  %265 = vst [vmem:[#allocation2 + $0x84] sm:$0xff] %v245_v37  ;;  %v226_v50 = vmax.f32 %v190_v45, 0.0  ;;  %v1197_v58 = vld [vmem:[#allocation2 + $0x3c] sm:$0xf0]  ;;  %v1196_v60 = vor.u32 %v1536_v57, %v1195_v51 }
  0x39   :  { %1093 = vmatpush.bf16.msrb.mxu3 %v1605_v0  ;;  %v231_v46 = vpack.c.bf16 %v199_v39, %v199_v39  ;;  %v236_v13 = vpack.c.bf16 %v208_v40, %v208_v40  ;;  %v1200_v17 = vor.u32 %v1532_v52, %v1197_v58  ;;  %v1223_v20 = vld [vmem:[#allocation2 + $0x58] sm:$0xf]  ;;  %v1540_v0 = vld [vmem:[#allocation2 + $0x5c] sm:$0xf] }
  0x3a   :  { %1037 = vmatpush.bf16.msrb.mxu0 %v1580_v1  ;;  %v217_v16 = vmax.f32 %v181_v41, 0.0  ;;  %v246_v59 = vpack.c.bf16 %v226_v50, %v226_v50 }
  0x3b   :  { %1056 = vmatpush.bf16.msrb.mxu1 %v1588_v42  ;;  %251 = vst [vmem:[#allocation2 + $0x20] sm:$0xf] %v231_v46  ;;  %v1544_v62 = vld [vmem:[#allocation2 + $0x78] sm:$0xf0]  ;;  %v1225_v1 = vld [vmem:[#allocation2 + $0x7c] sm:$0xf0] }
  0x3c   :  { %1075 = vmatpush.bf16.msrb.mxu2 %v1596_v55  ;;  %v241_v56 = vpack.c.bf16 %v217_v16, %v217_v16  ;;  %256 = vst [vmem:[#allocation2 + $0x44] sm:$0xf] %v236_v13  ;;  %v1614_v42 = vld [vmem:[%s2145_s1 + $0x218] sm:$0xff]  ;;  %v1224_v43 = vor.u32 %v1544_v62, %v1223_v20  ;;  %v1228_v2 = vor.u32 %v1540_v0, %v1225_v1 }
  0x3d   :  { %1094 = vmatpush.bf16.msrb.mxu3 %v1604_v63  ;;  %266 = vst [vmem:[#allocation2 + $0x8c] sm:$0xf] %v246_v59 }
  0x3e   :  { %1038 = vmatpush.bf16.msrb.mxu0 %v1579_v19  ;;  %261 = vst [vmem:[#allocation2 + $0x68] sm:$0xf] %v241_v56  ;;  %v1231_v53 = vld [vmem:[#allocation2 + $0x60] sm:$0xf]  ;;  %v1541_v5 = vld [vmem:[#allocation2 + $0x64] sm:$0xf] }
  0x3f   :  { %1057 = vmatpush.bf16.msrb.mxu1 %v1587_v27  ;;  %v1545_v4 = vld [vmem:[#allocation2 + $0x80] sm:$0xf0]  ;;  %v1233_v6 = vld [vmem:[#allocation2 + $0x84] sm:$0xf0] }
  0x40   :  { %1076 = vmatpush.bf16.msrb.mxu2 %v1595_v44  ;;  %v1232_v7 = vor.u32 %v1545_v4, %v1231_v53  ;;  %v1236_v8 = vor.u32 %v1541_v5, %v1233_v6 }
  0x41   :  { %1095 = vmatpush.bf16.msrb.mxu3 %v1603_v28  ;;  %1039 = vmatmul.bf16.vlgmr.msrb.gmra.mxu0 %v1188_v29 }
  0x42   :  { %1107 = vmatpush.bf16.msra.mxu0 %v1618_v35  ;;  %1058 = vmatmul.bf16.vlgmr.msrb.gmra.mxu1 %v1192_v48  ;;  %v1203_v11 = vld [vmem:[#allocation2 + $0x20] sm:$0xf] }
  0x43   :  { %1630 = vmatpush.bf16.msra.mxu1 %v1618_v35  ;;  %v1537_v12 = vld [vmem:[#allocation2 + $0x40] sm:$0xf0] }
  0x44   :  { %v1546_v22 = vld [vmem:[#allocation2 + $0x88] sm:$0xf0]  ;;  %v1204_v23 = vor.u32 %v1537_v12, %v1203_v11 }
  0x45   :  { %1077 = vmatmul.bf16.vlgmr.msrb.gmra.mxu2 %v1196_v60  ;;  %v1239_v14 = vld [vmem:[#allocation2 + $0x68] sm:$0xf] }
  0x46   :  { %1108 = vmatpush.bf16.msra.mxu0 %v1617_v49  ;;  %1096 = vmatmul.bf16.vlgmr.msrb.gmra.mxu3 %v1200_v17  ;;  %v1240_v21 = vor.u32 %v1546_v22, %v1239_v14 }
  0x47   :  { %1631 = vmatpush.bf16.msra.mxu1 %v1617_v49 }
  0x4a   :  { %1109 = vmatpush.bf16.msra.mxu0 %v1616_v18 }
  0x4b   :  { %1632 = vmatpush.bf16.msra.mxu1 %v1616_v18 }
  0x4e   :  { %1110 = vmatpush.bf16.msra.mxu0 %v1615_v61 }
  0x4f   :  { %1633 = vmatpush.bf16.msra.mxu1 %v1615_v61 }
  0x51   :  { %1044 = vmatmul.bf16.gmra.mxu0 %v1224_v43  ;;  %v1641_v43 = vmov 0.0  }
  0x52   :  { %1111 = vmatpush.bf16.msra.mxu0 %v1614_v42  ;;  %1063 = vmatmul.bf16.gmra.mxu1 %v1228_v2  ;;  %1158 = vst [vmem:[%s2149_s5] sm:$0xff] %v1641_v43 }
  0x53   :  { %1634 = vmatpush.bf16.msra.mxu1 %v1614_v42 }
  0x55   :  { %1082 = vmatmul.bf16.gmra.mxu2 %v1232_v7 }
  0x56   :  { %1112 = vmatpush.bf16.msra.mxu0 %v1613_v3  ;;  %1101 = vmatmul.bf16.gmra.mxu3 %v1236_v8 }
  0x57   :  { %1635 = vmatpush.bf16.msra.mxu1 %v1613_v3 }
  0x5a   :  { %1113 = vmatpush.bf16.msra.mxu0 %v1612_v54 }
  0x5b   :  { %1636 = vmatpush.bf16.msra.mxu1 %v1612_v54 }
  0x5e   :  { %1114 = vmatpush.bf16.msra.mxu0 %v1611_v47 }
  0x5f   :  { %1637 = vmatpush.bf16.msra.mxu1 %v1611_v47 }
  0x61   :  { %1115 = vmatmul.bf16.vlgmr.msra.gmra.mxu0 %v1204_v23 }
  0x62   :  { %1120 = vmatmul.bf16.vlgmr.msra.gmra.mxu1 %v1240_v21 }
  0x9e   :  { %v964_v55 = vpop.f32.mrf.mxu0 }
  0x9f   :  { %v983_v63 = vpop.f32.mrf.mxu1 }
  0xa0   :  { %v984_v45 = vadd.f32 %v983_v63, %v964_v55 }
  0xa6   :  { %v966_v9 = vpop.f32.mrf.mxu0 }
  0xa7   :  { %v985_v15 = vpop.f32.mrf.mxu1 }
  0xa8   :  { %v1002_v26 = vpop.f32.mrf.mxu2  ;;  %v986_v29 = vadd.f32 %v985_v15, %v966_v9 }
  0xa9   :  { %v1021_v10 = vpop.f32.mrf.mxu3  ;;  %v1003_v16 = vadd.f32 %v1002_v26, %v984_v45 }
  0xab   :  { %v1022_v52 = vadd.f32 %v1021_v10, %v1003_v16 }
  0xae   :  { %v969_v19 = vpop.f32.mrf.mxu0 }
  0xaf   :  { %v988_v27 = vpop.f32.mrf.mxu1 }
  0xb0   :  { %v1004_v30 = vpop.f32.mrf.mxu2  ;;  %v989_v48 = vadd.f32 %v988_v27, %v969_v19 }
  0xb1   :  { %v1023_v31 = vpop.f32.mrf.mxu3  ;;  %v1005_v50 = vadd.f32 %v1004_v30, %v986_v29 }
  0xb3   :  { %v1024_v60 = vadd.f32 %v1023_v31, %v1005_v50 }
  0xb6   :  { %v971_v32 = vpop.f32.mrf.mxu0 }
  0xb7   :  { %v990_v33 = vpop.f32.mrf.mxu1 }
  0xb8   :  { %v1007_v34 = vpop.f32.mrf.mxu2  ;;  %v991_v49 = vadd.f32 %v990_v33, %v971_v32 }
  0xb9   :  { %v1026_v35 = vpop.f32.mrf.mxu3  ;;  %v1008_v51 = vadd.f32 %v1007_v34, %v989_v48 }
  0xbb   :  { %v1027_v17 = vadd.f32 %v1026_v35, %v1008_v51 }
  0xbe   :  { %v1040_v36 = vpop.f32.mrf.mxu0 }
  0xbf   :  { %v1059_v37 = vpop.f32.mrf.mxu1  ;;  %v1041_v59 = vadd.f32 %v1040_v36, %v1022_v52 }
  0xc0   :  { %v1009_v38 = vpop.f32.mrf.mxu2 }
  0xc1   :  { %v1028_v24 = vpop.f32.mrf.mxu3  ;;  %v1010_v56 = vadd.f32 %v1009_v38, %v991_v49  ;;  %v1060_v1 = vadd.f32 %v1059_v37, %v1041_v59 }
  0xc3   :  { %v1029_v20 = vadd.f32 %v1028_v24, %v1010_v56 }
  0xc6   :  { %v1042_v25 = vpop.f32.mrf.mxu0 }
  0xc7   :  { %v1061_v39 = vpop.f32.mrf.mxu1  ;;  %v1043_v62 = vadd.f32 %v1042_v25, %v1024_v60 }
  0xc8   :  { %v1078_v40 = vpop.f32.mrf.mxu2 }
  0xc9   :  { %v1097_v41 = vpop.f32.mrf.mxu3  ;;  %v1079_v2 = vadd.f32 %v1078_v40, %v1060_v1  ;;  %v1062_v4 = vadd.f32 %v1061_v39, %v1043_v62 }
  0xcb   :  { %v1098_v47 = vadd.f32 %v1097_v41, %v1079_v2 }
  0xce   :  { %v1045_v44 = vpop.f32.mrf.mxu0 }
  0xcf   :  { %v1064_v28 = vpop.f32.mrf.mxu1  ;;  %v1046_v0 = vadd.f32 %v1045_v44, %v1027_v17 }
  0xd0   :  { %v1080_v46 = vpop.f32.mrf.mxu2 }
  0xd1   :  { %v1099_v13 = vpop.f32.mrf.mxu3  ;;  %v1065_v5 = vadd.f32 %v1064_v28, %v1046_v0  ;;  %v1081_v7 = vadd.f32 %v1080_v46, %v1062_v4 }
  0xd3   :  { %v1100_v22 = vadd.f32 %v1099_v13, %v1081_v7 }
  0xd6   :  { %v1047_v57 = vpop.f32.mrf.mxu0 }
  0xd7   :  { %v1066_v58 = vpop.f32.mrf.mxu1  ;;  %v1048_v42 = vadd.f32 %v1047_v57, %v1029_v20 }
  0xd8   :  { %v1083_v18 = vpop.f32.mrf.mxu2 }
  0xd9   :  { %v1102_v61 = vpop.f32.mrf.mxu3  ;;  %v1067_v6 = vadd.f32 %v1066_v58, %v1048_v42  ;;  %v1084_v8 = vadd.f32 %v1083_v18, %v1065_v5 }
  0xdb   :  { %v1103_v23 = vadd.f32 %v1102_v61, %v1084_v8 }
  0xde   :  { %v1116_v53 = vpop.f32.mrf.mxu0 }
  0xdf   :  { %v1121_v3 = vpop.f32.mrf.mxu1  ;;  %v1117_v14 = vadd.f32 %v1116_v53, %v1098_v47 }
  0xe0   :  { %v1085_v54 = vpop.f32.mrf.mxu2  ;;  %v1122_v9 = vadd.f32 %v1121_v3, %v1103_v23 }
  0xe1   :  { %v1086_v11 = vadd.f32 %v1085_v54, %v1067_v6  ;;  %v1104_v12 = vpop.f32.mrf.mxu3  ;;  %v1144_v10 = vmul.f32 %v1117_v14, %v1117_v14 }
  0xe2   :  { %v1146_v32 = vmul.f32 %v1122_v9, %v1122_v9 }
  0xe3   :  { %v1105_v21 = vadd.f32 %v1104_v12, %v1086_v11 }
  0xe6   :  { %v1118_v55 = vpop.f32.mrf.mxu0 }
  0xe7   :  { %v1123_v63 = vpop.f32.mrf.mxu1  ;;  %v1119_v15 = vadd.f32 %v1118_v55, %v1100_v22 }
  0xe8   :  { %v1124_v26 = vadd.f32 %v1123_v63, %v1105_v21 }
  0xe9   :  { %v1622_v19 = vpack.c.bf16 %v1119_v15, %v1117_v14  ;;  %v1134_v27 = vadd.f32 %v1119_v15, %v1117_v14  ;;  %v1145_v30 = vmul.f32 %v1119_v15, %v1119_v15 }
  0xea   :  { %v1627_v31 = vpack.c.bf16 %v1124_v26, %v1122_v9  ;;  %v1147_v36 = vmul.f32 %v1124_v26, %v1124_v26 }
  0xeb   :  { %1623 = vst [vmem:[%s2150_s4] sm:$0xff] %v1622_v19   ;;  %v1148_v33 = vadd.f32 %v1145_v30, %v1144_v10  ;;  %v1135_v34 = vadd.f32 %v1134_v27, %v1122_v9 }
  0xec   :  { %1629 = vst [vmem:[%s2150_s4 + $0x8] sm:$0xff] %v1627_v31  }
  0xed   :  { %v1136_v35 = vadd.f32 %v1135_v34, %v1124_v26  ;;  %v1149_v37 = vadd.f32 %v1148_v33, %v1146_v32 }
  0xef   :  { %v1137_v38 = vrot.slane %v1136_v35, 4  ;;  %v1150_v24 = vadd.f32 %v1149_v37, %v1147_v36 }
  0xf1   :  { %v1138_v25 = vadd.f32 %v1137_v38, %v1136_v35  ;;  %v1151_v39 = vrot.slane %v1150_v24, 4 }
  0xf3   :  { %v1139_v40 = vrot.slane %v1138_v25, 2  ;;  %v1152_v41 = vadd.f32 %v1151_v39, %v1150_v24 }
  0xf5   :  { %v1140_v44 = vadd.f32 %v1139_v40, %v1138_v25  ;;  %v1153_v28 = vrot.slane %v1152_v41, 2 }
  0xf7   :  { %v1141_v45 = vrot.slane %v1140_v44, 1  ;;  %v1154_v46 = vadd.f32 %v1153_v28, %v1152_v41 }
  0xf9   :  { %v1142_v13 = vadd.f32 %v1141_v45, %v1140_v44  ;;  %v1155_v16 = vrot.slane %v1154_v46, 1 }
  0xfb   :  { %v1156_v29 = vadd.f32 %v1155_v16, %v1154_v46  ;;  %1159 = vst [vmem:[%s2149_s5] sm:$0x1] %v1142_v13 }
  0xfd   :  { %1160 = vst [vmem:[%s2149_s5 + $0x1] sm:$0x1] %v1156_v29 }

// kernel: resnet34_3_forward.19
= control target key start
LH: loop header
LB: loop body
LE: loop exit
PB: predicated region body
PF: predicated region fallthrough
CT: control target
= control target key end

     0   :  { %s1745_s1 = inlined_call_operand.vmem [shape: bf16[1152,128], index: 1, kind: input, shape index: {}]   ;;  %s1746_s0 = inlined_call_operand.vmem [shape: bf16[32,1152], index: 0, kind: input, shape index: {}]   ;;  %s1747_s3 = inlined_call_operand.vmem [shape: f32[1,8,128], index: 3, kind: output, shape index: {1}]   ;;  %s1748_s2 = inlined_call_operand.vmem [shape: bf16[32,128], index: 2, kind: output, shape index: {0}]  }
   0x1   :  { %v1300_v0 = vld [vmem:[%s1745_s1 + $0x38] sm:$0xff]  ;;  %v1299_v4 = vld [vmem:[%s1745_s1 + $0x30] sm:$0xff]  ;;  %v1298_v8 = vld [vmem:[%s1745_s1 + $0x28] sm:$0xff] }
   0x2   :  { %v1308_v1 = vld [vmem:[%s1745_s1 + $0x78] sm:$0xff]  ;;  %701 = vmatpush.bf16.msra.mxu0 %v1300_v0  ;;  %v1307_v5 = vld [vmem:[%s1745_s1 + $0x70] sm:$0xff]  ;;  %v1306_v9 = vld [vmem:[%s1745_s1 + $0x68] sm:$0xff] }
   0x3   :  { %v1316_v2 = vld [vmem:[%s1745_s1 + $0xb8] sm:$0xff]  ;;  %720 = vmatpush.bf16.msra.mxu1 %v1308_v1  ;;  %v1315_v6 = vld [vmem:[%s1745_s1 + $0xb0] sm:$0xff]  ;;  %v1314_v10 = vld [vmem:[%s1745_s1 + $0xa8] sm:$0xff] }
   0x4   :  { %v1324_v3 = vld [vmem:[%s1745_s1 + $0xf8] sm:$0xff]  ;;  %739 = vmatpush.bf16.msra.mxu2 %v1316_v2  ;;  %v1323_v7 = vld [vmem:[%s1745_s1 + $0xf0] sm:$0xff]  ;;  %v1322_v11 = vld [vmem:[%s1745_s1 + $0xe8] sm:$0xff] }
   0x5   :  { %758 = vmatpush.bf16.msra.mxu3 %v1324_v3  ;;  %v1297_v12 = vld [vmem:[%s1745_s1 + $0x20] sm:$0xff]  ;;  %v1296_v16 = vld [vmem:[%s1745_s1 + $0x18] sm:$0xff]  ;;  %v1295_v20 = vld [vmem:[%s1745_s1 + $0x10] sm:$0xff] }
   0x6   :  { %702 = vmatpush.bf16.msra.mxu0 %v1299_v4  ;;  %v1305_v13 = vld [vmem:[%s1745_s1 + $0x60] sm:$0xff]  ;;  %v1304_v17 = vld [vmem:[%s1745_s1 + $0x58] sm:$0xff]  ;;  %v1303_v21 = vld [vmem:[%s1745_s1 + $0x50] sm:$0xff] }
   0x7   :  { %721 = vmatpush.bf16.msra.mxu1 %v1307_v5  ;;  %v1313_v14 = vld [vmem:[%s1745_s1 + $0xa0] sm:$0xff]  ;;  %v1312_v18 = vld [vmem:[%s1745_s1 + $0x98] sm:$0xff]  ;;  %v1311_v22 = vld [vmem:[%s1745_s1 + $0x90] sm:$0xff] }
   0x8   :  { %740 = vmatpush.bf16.msra.mxu2 %v1315_v6  ;;  %v1321_v15 = vld [vmem:[%s1745_s1 + $0xe0] sm:$0xff]  ;;  %v1320_v19 = vld [vmem:[%s1745_s1 + $0xd8] sm:$0xff]  ;;  %v1319_v23 = vld [vmem:[%s1745_s1 + $0xd0] sm:$0xff] }
   0x9   :  { %759 = vmatpush.bf16.msra.mxu3 %v1323_v7  ;;  %v1294_v24 = vld [vmem:[%s1745_s1 + $0x8] sm:$0xff]  ;;  %v1293_v28 = vld [vmem:[%s1745_s1] sm:$0xff]  ;;  %v927_v39 = vld [vmem:[%s1746_s0 + $0x2c] sm:$0xf0] }
   0xa   :  { %703 = vmatpush.bf16.msra.mxu0 %v1298_v8  ;;  %v1302_v25 = vld [vmem:[%s1745_s1 + $0x48] sm:$0xff]  ;;  %v1301_v29 = vld [vmem:[%s1745_s1 + $0x40] sm:$0xff]  ;;  %v1332_v40 = vld [vmem:[%s1745_s1 + $0x138] sm:$0xff] }
   0xb   :  { %722 = vmatpush.bf16.msra.mxu1 %v1306_v9  ;;  %v1310_v26 = vld [vmem:[%s1745_s1 + $0x88] sm:$0xff]  ;;  %v1309_v30 = vld [vmem:[%s1745_s1 + $0x80] sm:$0xff]  ;;  %v1340_v41 = vld [vmem:[%s1745_s1 + $0x178] sm:$0xff] }
   0xc   :  { %741 = vmatpush.bf16.msra.mxu2 %v1314_v10  ;;  %v1318_v27 = vld [vmem:[%s1745_s1 + $0xc8] sm:$0xff]  ;;  %v1317_v31 = vld [vmem:[%s1745_s1 + $0xc0] sm:$0xff]  ;;  %v1348_v46 = vld [vmem:[%s1745_s1 + $0x1b8] sm:$0xff] }
   0xd   :  { %760 = vmatpush.bf16.msra.mxu3 %v1322_v11  ;;  %v917_v32 = vld [vmem:[%s1746_s0] sm:$0xf]  ;;  %v1279_v33 = vld [vmem:[%s1746_s0 + $0x20] sm:$0xf0]  ;;  %v919_v35 = vld [vmem:[%s1746_s0 + $0x24] sm:$0xf0] }
   0xe   :  { %704 = vmatpush.bf16.msra.mxu0 %v1297_v12  ;;  %v1275_v34 = vld [vmem:[%s1746_s0 + $0x4] sm:$0xf]  ;;  %v925_v36 = vld [vmem:[%s1746_s0 + $0x8] sm:$0xf]  ;;  %v1280_v37 = vld [vmem:[%s1746_s0 + $0x28] sm:$0xf0]  ;;  %v918_v42 = vor.u32 %v1279_v33, %v917_v32 }
   0xf   :  { %723 = vmatpush.bf16.msra.mxu1 %v1305_v13  ;;  %v1276_v38 = vld [vmem:[%s1746_s0 + $0xc] sm:$0xf]  ;;  %v922_v43 = vor.u32 %v1275_v34, %v919_v35  ;;  %v926_v44 = vor.u32 %v1280_v37, %v925_v36  ;;  %v1356_v47 = vld [vmem:[%s1745_s1 + $0x1f8] sm:$0xff]  ;;  %v1331_v48 = vld [vmem:[%s1745_s1 + $0x130] sm:$0xff] }
  0x10   :  { %742 = vmatpush.bf16.msra.mxu2 %v1313_v14  ;;  %v930_v45 = vor.u32 %v1276_v38, %v927_v39  ;;  %v1339_v49 = vld [vmem:[%s1745_s1 + $0x170] sm:$0xff]  ;;  %v1330_v52 = vld [vmem:[%s1745_s1 + $0x128] sm:$0xff]  ;;  %v1329_v56 = vld [vmem:[%s1745_s1 + $0x120] sm:$0xff] }
  0x11   :  { %761 = vmatpush.bf16.msra.mxu3 %v1321_v15  ;;  %v1347_v50 = vld [vmem:[%s1745_s1 + $0x1b0] sm:$0xff]  ;;  %v1338_v53 = vld [vmem:[%s1745_s1 + $0x168] sm:$0xff]  ;;  %v1337_v57 = vld [vmem:[%s1745_s1 + $0x160] sm:$0xff] }
  0x12   :  { %705 = vmatpush.bf16.msra.mxu0 %v1296_v16  ;;  %v1355_v51 = vld [vmem:[%s1745_s1 + $0x1f0] sm:$0xff]  ;;  %v1346_v54 = vld [vmem:[%s1745_s1 + $0x1a8] sm:$0xff]  ;;  %v1345_v58 = vld [vmem:[%s1745_s1 + $0x1a0] sm:$0xff] }
  0x13   :  { %724 = vmatpush.bf16.msra.mxu1 %v1304_v17  ;;  %v1354_v55 = vld [vmem:[%s1745_s1 + $0x1e8] sm:$0xff]  ;;  %v1353_v59 = vld [vmem:[%s1745_s1 + $0x1e0] sm:$0xff]  ;;  %v955_v63 = vld [vmem:[%s1746_s0 + $0x6c] sm:$0xf0] }
  0x14   :  { %743 = vmatpush.bf16.msra.mxu2 %v1312_v18  ;;  %v953_v60 = vld [vmem:[%s1746_s0 + $0x48] sm:$0xf]  ;;  %v1288_v61 = vld [vmem:[%s1746_s0 + $0x68] sm:$0xf0]  ;;  %v961_v0 = vld [vmem:[%s1746_s0 + $0x50] sm:$0xf] }
  0x15   :  { %762 = vmatpush.bf16.msra.mxu3 %v1320_v19  ;;  %v1284_v62 = vld [vmem:[%s1746_s0 + $0x4c] sm:$0xf]  ;;  %v1289_v1 = vld [vmem:[%s1746_s0 + $0x70] sm:$0xf0]  ;;  %v963_v3 = vld [vmem:[%s1746_s0 + $0x74] sm:$0xf0]  ;;  %v954_v6 = vor.u32 %v1288_v61, %v953_v60 }
  0x16   :  { %706 = vmatpush.bf16.msra.mxu0 %v1295_v20  ;;  %v1285_v2 = vld [vmem:[%s1746_s0 + $0x54] sm:$0xf]  ;;  %v1328_v4 = vld [vmem:[%s1745_s1 + $0x118] sm:$0xff]  ;;  %v958_v7 = vor.u32 %v1284_v62, %v955_v63  ;;  %v962_v8 = vor.u32 %v1289_v1, %v961_v0  ;;  %v1326_v16 = vld [vmem:[%s1745_s1 + $0x108] sm:$0xff] }
  0x17   :  { %725 = vmatpush.bf16.msra.mxu1 %v1303_v21  ;;  %v1336_v5 = vld [vmem:[%s1745_s1 + $0x158] sm:$0xff]  ;;  %v966_v9 = vor.u32 %v1285_v2, %v963_v3  ;;  %v1327_v12 = vld [vmem:[%s1745_s1 + $0x110] sm:$0xff]  ;;  %v1334_v17 = vld [vmem:[%s1745_s1 + $0x148] sm:$0xff] }
  0x18   :  { %744 = vmatpush.bf16.msra.mxu2 %v1311_v22  ;;  %v1344_v10 = vld [vmem:[%s1745_s1 + $0x198] sm:$0xff]  ;;  %v1335_v13 = vld [vmem:[%s1745_s1 + $0x150] sm:$0xff]  ;;  %v1342_v18 = vld [vmem:[%s1745_s1 + $0x188] sm:$0xff] }
  0x19   :  { %763 = vmatpush.bf16.msra.mxu3 %v1319_v23  ;;  %v1352_v11 = vld [vmem:[%s1745_s1 + $0x1d8] sm:$0xff]  ;;  %v1343_v14 = vld [vmem:[%s1745_s1 + $0x190] sm:$0xff]  ;;  %v1350_v19 = vld [vmem:[%s1745_s1 + $0x1c8] sm:$0xff] }
  0x1a   :  { %707 = vmatpush.bf16.msra.mxu0 %v1294_v24  ;;  %v1351_v15 = vld [vmem:[%s1745_s1 + $0x1d0] sm:$0xff]  ;;  %v1325_v20 = vld [vmem:[%s1745_s1 + $0x100] sm:$0xff]  ;;  %v1362_v38 = vld [vmem:[%s1745_s1 + $0x228] sm:$0xff] }
  0x1b   :  { %726 = vmatpush.bf16.msra.mxu1 %v1302_v25  ;;  %v1333_v21 = vld [vmem:[%s1745_s1 + $0x140] sm:$0xff]  ;;  %v933_v24 = vld [vmem:[%s1746_s0 + $0x10] sm:$0xf]  ;;  %v1281_v25 = vld [vmem:[%s1746_s0 + $0x30] sm:$0xf0] }
  0x1c   :  { %745 = vmatpush.bf16.msra.mxu2 %v1310_v26  ;;  %v1341_v22 = vld [vmem:[%s1745_s1 + $0x180] sm:$0xff]  ;;  %v1364_v26 = vld [vmem:[%s1745_s1 + $0x238] sm:$0xff]  ;;  %v934_v33 = vor.u32 %v1281_v25, %v933_v24  ;;  %v1363_v37 = vld [vmem:[%s1745_s1 + $0x230] sm:$0xff] }
  0x1d   :  { %764 = vmatpush.bf16.msra.mxu3 %v1318_v27  ;;  %v1349_v23 = vld [vmem:[%s1745_s1 + $0x1c0] sm:$0xff]  ;;  %v1277_v27 = vld [vmem:[%s1746_s0 + $0x14] sm:$0xf] }
  0x1e   :  { %708 = vmatpush.bf16.msra.mxu0 %v1293_v28  ;;  %v935_v28 = vld [vmem:[%s1746_s0 + $0x34] sm:$0xf0]  ;;  %v943_v32 = vld [vmem:[%s1746_s0 + $0x3c] sm:$0xf0] }
  0x1f   :  { %727 = vmatpush.bf16.msra.mxu1 %v1301_v29  ;;  %v941_v29 = vld [vmem:[%s1746_s0 + $0x18] sm:$0xf]  ;;  %v938_v34 = vor.u32 %v1277_v27, %v935_v28  ;;  %v1361_v39 = vld [vmem:[%s1745_s1 + $0x220] sm:$0xff] }
  0x20   :  { %746 = vmatpush.bf16.msra.mxu2 %v1309_v30  ;;  %v1282_v30 = vld [vmem:[%s1746_s0 + $0x38] sm:$0xf0] }
  0x21   :  { %765 = vmatpush.bf16.msra.mxu3 %v1317_v31  ;;  %709 = vmatmul.bf16.vlgmr.msra.gmra.mxu0 %v918_v42  ;;  %v1278_v31 = vld [vmem:[%s1746_s0 + $0x1c] sm:$0xf]  ;;  %v942_v35 = vor.u32 %v1282_v30, %v941_v29 }
  0x22   :  { %777 = vmatpush.bf16.msrb.mxu0 %v1332_v40  ;;  %728 = vmatmul.bf16.vlgmr.msra.gmra.mxu1 %v922_v43  ;;  %v946_v36 = vor.u32 %v1278_v31, %v943_v32  ;;  %v969_v40 = vld [vmem:[%s1746_s0 + $0x58] sm:$0xf]  ;;  %v1286_v42 = vld [vmem:[%s1746_s0 + $0x5c] sm:$0xf]  ;;  %v971_v43 = vld [vmem:[%s1746_s0 + $0x7c] sm:$0xf0] }
  0x23   :  { %796 = vmatpush.bf16.msrb.mxu1 %v1340_v41  ;;  %747 = vmatmul.bf16.vlgmr.msra.gmra.mxu2 %v926_v44  ;;  %v1290_v41 = vld [vmem:[%s1746_s0 + $0x78] sm:$0xf0]  ;;  %v977_v44 = vld [vmem:[%s1746_s0 + $0x60] sm:$0xf] }
  0x24   :  { %766 = vmatmul.bf16.vlgmr.msra.gmra.mxu3 %v930_v45  ;;  %815 = vmatpush.bf16.msrb.mxu2 %v1348_v46  ;;  %v1291_v45 = vld [vmem:[%s1746_s0 + $0x80] sm:$0xf0]  ;;  %v1360_v46 = vld [vmem:[%s1745_s1 + $0x218] sm:$0xff] }
  0x25   :  { %834 = vmatpush.bf16.msrb.mxu3 %v1356_v47  ;;  %v1287_v47 = vld [vmem:[%s1746_s0 + $0x64] sm:$0xf] }
  0x26   :  { %778 = vmatpush.bf16.msrb.mxu0 %v1331_v48  ;;  %v979_v48 = vld [vmem:[%s1746_s0 + $0x84] sm:$0xf0] }
  0x27   :  { %797 = vmatpush.bf16.msrb.mxu1 %v1339_v49  ;;  %v970_v49 = vor.u32 %v1290_v41, %v969_v40 }
  0x28   :  { %816 = vmatpush.bf16.msrb.mxu2 %v1347_v50  ;;  %v974_v50 = vor.u32 %v1286_v42, %v971_v43 }
  0x29   :  { %835 = vmatpush.bf16.msrb.mxu3 %v1355_v51  ;;  %v978_v51 = vor.u32 %v1291_v45, %v977_v44  ;;  %v1385_v44 = vmov 0.0  }
  0x2a   :  { %779 = vmatpush.bf16.msrb.mxu0 %v1330_v52  ;;  %v982_v52 = vor.u32 %v1287_v47, %v979_v48  ;;  %904 = vst [vmem:[%s1747_s3] sm:$0xff] %v1385_v44 }
  0x2b   :  { %798 = vmatpush.bf16.msrb.mxu1 %v1338_v53  ;;  %v1359_v53 = vld [vmem:[%s1745_s1 + $0x210] sm:$0xff] }
  0x2c   :  { %817 = vmatpush.bf16.msrb.mxu2 %v1346_v54  ;;  %v1358_v54 = vld [vmem:[%s1745_s1 + $0x208] sm:$0xff] }
  0x2d   :  { %836 = vmatpush.bf16.msrb.mxu3 %v1354_v55  ;;  %v1357_v55 = vld [vmem:[%s1745_s1 + $0x200] sm:$0xff] }
  0x2e   :  { %780 = vmatpush.bf16.msrb.mxu0 %v1329_v56  ;;  %v949_v56 = vld [vmem:[%s1746_s0 + $0x20] sm:$0xf] }
  0x2f   :  { %799 = vmatpush.bf16.msrb.mxu1 %v1337_v57  ;;  %v1283_v57 = vld [vmem:[%s1746_s0 + $0x40] sm:$0xf0] }
  0x30   :  { %818 = vmatpush.bf16.msrb.mxu2 %v1345_v58  ;;  %v985_v58 = vld [vmem:[%s1746_s0 + $0x68] sm:$0xf]  ;;  %v950_v60 = vor.u32 %v1283_v57, %v949_v56 }
  0x31   :  { %837 = vmatpush.bf16.msrb.mxu3 %v1353_v59  ;;  %714 = vmatmul.bf16.gmra.mxu0 %v954_v6  ;;  %v1292_v59 = vld [vmem:[%s1746_s0 + $0x88] sm:$0xf0] }
  0x32   :  { %781 = vmatpush.bf16.msrb.mxu0 %v1328_v4  ;;  %733 = vmatmul.bf16.gmra.mxu1 %v958_v7  ;;  %v986_v61 = vor.u32 %v1292_v59, %v985_v58 }
  0x33   :  { %800 = vmatpush.bf16.msrb.mxu1 %v1336_v5  ;;  %752 = vmatmul.bf16.gmra.mxu2 %v962_v8 }
  0x34   :  { %771 = vmatmul.bf16.gmra.mxu3 %v966_v9  ;;  %819 = vmatpush.bf16.msrb.mxu2 %v1344_v10 }
  0x35   :  { %838 = vmatpush.bf16.msrb.mxu3 %v1352_v11 }
  0x36   :  { %782 = vmatpush.bf16.msrb.mxu0 %v1327_v12 }
  0x37   :  { %801 = vmatpush.bf16.msrb.mxu1 %v1335_v13 }
  0x38   :  { %820 = vmatpush.bf16.msrb.mxu2 %v1343_v14 }
  0x39   :  { %839 = vmatpush.bf16.msrb.mxu3 %v1351_v15 }
  0x3a   :  { %783 = vmatpush.bf16.msrb.mxu0 %v1326_v16 }
  0x3b   :  { %802 = vmatpush.bf16.msrb.mxu1 %v1334_v17 }
  0x3c   :  { %821 = vmatpush.bf16.msrb.mxu2 %v1342_v18 }
  0x3d   :  { %840 = vmatpush.bf16.msrb.mxu3 %v1350_v19 }
  0x3e   :  { %784 = vmatpush.bf16.msrb.mxu0 %v1325_v20 }
  0x3f   :  { %803 = vmatpush.bf16.msrb.mxu1 %v1333_v21 }
  0x40   :  { %822 = vmatpush.bf16.msrb.mxu2 %v1341_v22 }
  0x41   :  { %841 = vmatpush.bf16.msrb.mxu3 %v1349_v23  ;;  %785 = vmatmul.bf16.vlgmr.msrb.gmra.mxu0 %v934_v33 }
  0x42   :  { %853 = vmatpush.bf16.msra.mxu0 %v1364_v26  ;;  %804 = vmatmul.bf16.vlgmr.msrb.gmra.mxu1 %v938_v34 }
  0x43   :  { %1376 = vmatpush.bf16.msra.mxu1 %v1364_v26  ;;  %823 = vmatmul.bf16.vlgmr.msrb.gmra.mxu2 %v942_v35 }
  0x44   :  { %842 = vmatmul.bf16.vlgmr.msrb.gmra.mxu3 %v946_v36 }
  0x46   :  { %854 = vmatpush.bf16.msra.mxu0 %v1363_v37 }
  0x47   :  { %1377 = vmatpush.bf16.msra.mxu1 %v1363_v37 }
  0x4a   :  { %855 = vmatpush.bf16.msra.mxu0 %v1362_v38 }
  0x4b   :  { %1378 = vmatpush.bf16.msra.mxu1 %v1362_v38 }
  0x4e   :  { %856 = vmatpush.bf16.msra.mxu0 %v1361_v39 }
  0x4f   :  { %1379 = vmatpush.bf16.msra.mxu1 %v1361_v39 }
  0x51   :  { %790 = vmatmul.bf16.gmra.mxu0 %v970_v49 }
  0x52   :  { %857 = vmatpush.bf16.msra.mxu0 %v1360_v46  ;;  %809 = vmatmul.bf16.gmra.mxu1 %v974_v50 }
  0x53   :  { %1380 = vmatpush.bf16.msra.mxu1 %v1360_v46  ;;  %828 = vmatmul.bf16.gmra.mxu2 %v978_v51 }
  0x54   :  { %847 = vmatmul.bf16.gmra.mxu3 %v982_v52 }
  0x56   :  { %858 = vmatpush.bf16.msra.mxu0 %v1359_v53 }
  0x57   :  { %1381 = vmatpush.bf16.msra.mxu1 %v1359_v53 }
  0x5a   :  { %859 = vmatpush.bf16.msra.mxu0 %v1358_v54 }
  0x5b   :  { %1382 = vmatpush.bf16.msra.mxu1 %v1358_v54 }
  0x5e   :  { %860 = vmatpush.bf16.msra.mxu0 %v1357_v55 }
  0x5f   :  { %1383 = vmatpush.bf16.msra.mxu1 %v1357_v55 }
  0x61   :  { %861 = vmatmul.bf16.vlgmr.msra.gmra.mxu0 %v950_v60 }
  0x62   :  { %866 = vmatmul.bf16.vlgmr.msra.gmra.mxu1 %v986_v61 }
  0x9e   :  { %v710_v62 = vpop.f32.mrf.mxu0 }
  0x9f   :  { %v729_v63 = vpop.f32.mrf.mxu1 }
  0xa0   :  { %v730_v24 = vadd.f32 %v729_v63, %v710_v62 }
  0xa6   :  { %v748_v0 = vpop.f32.mrf.mxu2  ;;  %v712_v2 = vpop.f32.mrf.mxu0 }
  0xa7   :  { %v767_v1 = vpop.f32.mrf.mxu3  ;;  %v731_v3 = vpop.f32.mrf.mxu1  ;;  %v749_v25 = vadd.f32 %v748_v0, %v730_v24 }
  0xa8   :  { %v732_v26 = vadd.f32 %v731_v3, %v712_v2 }
  0xa9   :  { %v768_v33 = vadd.f32 %v767_v1, %v749_v25 }
  0xae   :  { %v750_v4 = vpop.f32.mrf.mxu2  ;;  %v715_v6 = vpop.f32.mrf.mxu0 }
  0xaf   :  { %v769_v5 = vpop.f32.mrf.mxu3  ;;  %v734_v7 = vpop.f32.mrf.mxu1  ;;  %v751_v29 = vadd.f32 %v750_v4, %v732_v26 }
  0xb0   :  { %v735_v27 = vadd.f32 %v734_v7, %v715_v6 }
  0xb1   :  { %v770_v38 = vadd.f32 %v769_v5, %v751_v29 }
  0xb6   :  { %v753_v8 = vpop.f32.mrf.mxu2  ;;  %v717_v10 = vpop.f32.mrf.mxu0 }
  0xb7   :  { %v772_v9 = vpop.f32.mrf.mxu3  ;;  %v736_v11 = vpop.f32.mrf.mxu1  ;;  %v754_v30 = vadd.f32 %v753_v8, %v735_v27 }
  0xb8   :  { %v737_v28 = vadd.f32 %v736_v11, %v717_v10 }
  0xb9   :  { %v773_v39 = vadd.f32 %v772_v9, %v754_v30 }
  0xbe   :  { %v755_v12 = vpop.f32.mrf.mxu2  ;;  %v786_v14 = vpop.f32.mrf.mxu0 }
  0xbf   :  { %v774_v13 = vpop.f32.mrf.mxu3  ;;  %v805_v15 = vpop.f32.mrf.mxu1  ;;  %v756_v31 = vadd.f32 %v755_v12, %v737_v28  ;;  %v787_v36 = vadd.f32 %v786_v14, %v768_v33 }
  0xc1   :  { %v775_v40 = vadd.f32 %v774_v13, %v756_v31  ;;  %v806_v45 = vadd.f32 %v805_v15, %v787_v36 }
  0xc6   :  { %v824_v16 = vpop.f32.mrf.mxu2  ;;  %v788_v18 = vpop.f32.mrf.mxu0 }
  0xc7   :  { %v843_v17 = vpop.f32.mrf.mxu3  ;;  %v807_v19 = vpop.f32.mrf.mxu1  ;;  %v789_v41 = vadd.f32 %v788_v18, %v770_v38  ;;  %v825_v47 = vadd.f32 %v824_v16, %v806_v45 }
  0xc9   :  { %v808_v50 = vadd.f32 %v807_v19, %v789_v41  ;;  %v844_v56 = vadd.f32 %v843_v17, %v825_v47 }
  0xce   :  { %v826_v20 = vpop.f32.mrf.mxu2  ;;  %v791_v22 = vpop.f32.mrf.mxu0 }
  0xcf   :  { %v845_v21 = vpop.f32.mrf.mxu3  ;;  %v810_v23 = vpop.f32.mrf.mxu1  ;;  %v792_v42 = vadd.f32 %v791_v22, %v773_v39  ;;  %v827_v53 = vadd.f32 %v826_v20, %v808_v50 }
  0xd1   :  { %v811_v51 = vadd.f32 %v810_v23, %v792_v42  ;;  %v846_v59 = vadd.f32 %v845_v21, %v827_v53 }
  0xd6   :  { %v829_v32 = vpop.f32.mrf.mxu2  ;;  %v793_v34 = vpop.f32.mrf.mxu0 }
  0xd7   :  { %v812_v35 = vpop.f32.mrf.mxu1  ;;  %v848_v37 = vpop.f32.mrf.mxu3  ;;  %v794_v43 = vadd.f32 %v793_v34, %v775_v40  ;;  %v830_v54 = vadd.f32 %v829_v32, %v811_v51 }
  0xd9   :  { %v813_v52 = vadd.f32 %v812_v35, %v794_v43  ;;  %v849_v60 = vadd.f32 %v848_v37, %v830_v54 }
  0xde   :  { %v831_v46 = vpop.f32.mrf.mxu2  ;;  %v862_v48 = vpop.f32.mrf.mxu0 }
  0xdf   :  { %v867_v49 = vpop.f32.mrf.mxu1  ;;  %v832_v55 = vadd.f32 %v831_v46, %v813_v52  ;;  %v850_v57 = vpop.f32.mrf.mxu3  ;;  %v863_v58 = vadd.f32 %v862_v48, %v844_v56 }
  0xe0   :  { %v868_v0 = vadd.f32 %v867_v49, %v849_v60 }
  0xe1   :  { %v851_v61 = vadd.f32 %v850_v57, %v832_v55  ;;  %v890_v3 = vmul.f32 %v863_v58, %v863_v58 }
  0xe2   :  { %v892_v8 = vmul.f32 %v868_v0, %v868_v0 }
  0xe6   :  { %v864_v62 = vpop.f32.mrf.mxu0 }
  0xe7   :  { %v869_v63 = vpop.f32.mrf.mxu1  ;;  %v865_v1 = vadd.f32 %v864_v62, %v846_v59 }
  0xe8   :  { %v870_v2 = vadd.f32 %v869_v63, %v851_v61 }
  0xe9   :  { %v1368_v4 = vpack.c.bf16 %v865_v1, %v863_v58  ;;  %v880_v5 = vadd.f32 %v865_v1, %v863_v58  ;;  %v891_v6 = vmul.f32 %v865_v1, %v865_v1 }
  0xea   :  { %v1373_v7 = vpack.c.bf16 %v870_v2, %v868_v0  ;;  %v893_v12 = vmul.f32 %v870_v2, %v870_v2 }
  0xeb   :  { %1369 = vst [vmem:[%s1748_s2] sm:$0xff] %v1368_v4   ;;  %v894_v9 = vadd.f32 %v891_v6, %v890_v3  ;;  %v881_v10 = vadd.f32 %v880_v5, %v868_v0 }
  0xec   :  { %1375 = vst [vmem:[%s1748_s2 + $0x8] sm:$0xff] %v1373_v7  }
  0xed   :  { %v882_v11 = vadd.f32 %v881_v10, %v870_v2  ;;  %v895_v13 = vadd.f32 %v894_v9, %v892_v8 }
  0xef   :  { %v883_v14 = vrot.slane %v882_v11, 4  ;;  %v896_v15 = vadd.f32 %v895_v13, %v893_v12 }
  0xf1   :  { %v884_v16 = vadd.f32 %v883_v14, %v882_v11  ;;  %v897_v17 = vrot.slane %v896_v15, 4 }
  0xf3   :  { %v885_v18 = vrot.slane %v884_v16, 2  ;;  %v898_v19 = vadd.f32 %v897_v17, %v896_v15 }
  0xf5   :  { %v886_v20 = vadd.f32 %v885_v18, %v884_v16  ;;  %v899_v21 = vrot.slane %v898_v19, 2 }
  0xf7   :  { %v887_v22 = vrot.slane %v886_v20, 1  ;;  %v900_v23 = vadd.f32 %v899_v21, %v898_v19 }
  0xf9   :  { %v888_v24 = vadd.f32 %v887_v22, %v886_v20  ;;  %v901_v25 = vrot.slane %v900_v23, 1 }
  0xfb   :  { %v902_v26 = vadd.f32 %v901_v25, %v900_v23  ;;  %905 = vst [vmem:[%s1747_s3] sm:$0x1] %v888_v24 }
  0xfd   :  { %906 = vst [vmem:[%s1747_s3 + $0x1] sm:$0x1] %v902_v26 }

</bundles_post_ra>
